<compile_context>
chip_gen: v6e
topology: v6e:2x2x1
jax: 0.10.0
libtpu: 0.0.40
codegen_flags: <defaults>
</compile_context>

<pallas_src>
import math

import jax
import jax.numpy as jnp
from jax import lax
from jax.experimental import pallas as pl
from jax.experimental.pallas import tpu as pltpu


# --------------------------------------------------------------------------
# small in-kernel helpers (bf16 MXU inputs, f32 accumulation / elementwise)
# --------------------------------------------------------------------------

def _bf16(x):
    return x.astype(jnp.bfloat16)


def _mm(a, b):
    """a @ b on the MXU with bf16 inputs and f32 accumulation."""
    return jnp.dot(_bf16(a), _bf16(b), preferred_element_type=jnp.float32)


def _mm_nt(a, b):
    """a @ b.T (contract last dims of both) with bf16 inputs, f32 accumulation."""
    return lax.dot_general(_bf16(a), _bf16(b), (((1,), (1,)), ((), ())),
                           preferred_element_type=jnp.float32)


def _layernorm(y, g, b):
    mu = jnp.mean(y, axis=-1, keepdims=True)
    var = jnp.mean((y - mu) ** 2, axis=-1, keepdims=True)
    return (y - mu) * lax.rsqrt(var + 1e-12) * g + b


def _gelu(x):
    # TODO(synk): XLNet uses exact erf-based gelu; tanh approximation used here.
    return 0.5 * x * (1.0 + jnp.tanh(
        0.7978845608028654 * (x + 0.044715 * x * x * x)))


# --------------------------------------------------------------------------
# fused XLNet layer kernel: rel-attention + out proj + LN + FFN + LN
# --------------------------------------------------------------------------

def _xlnet_layer_kernel(x_ref, pad_ref, ttr_ref, ttc_ref, kr_ref,
                        wq_ref, wk_ref, wv_ref, wo_ref,
                        rw_ref, rr_ref, rs_ref, seg_ref,
                        ln1g_ref, ln1b_ref,
                        w1_ref, b1_ref, w2_ref, b2_ref,
                        ln2g_ref, ln2b_ref,
                        o_ref):
    x = x_ref[0]                                    # (S, D) f32
    s = x.shape[0]
    n_head, d_head = rw_ref.shape
    scale = 1.0 / math.sqrt(d_head)

    # ---- additive attention mask + segment-difference, built from (1,S)/(S,1) vectors
    padk = pad_ref[0]                               # (1, S): 1.0 where key is padding
    row_ids = lax.broadcasted_iota(jnp.int32, (s, s), 0)
    col_ids = lax.broadcasted_iota(jnp.int32, (s, s), 1)
    masked = jnp.logical_and(padk > 0.5, row_ids != col_ids)
    mask_add = jnp.where(masked, -1e30, 0.0)        # (S, S) f32
    segdiff = ttc_ref[0] != ttr_ref[0]              # (S,1)!=(1,S) -> (S,S) bool

    # ---- QKV projections (bf16 MXU); 1/sqrt(d_head) folded into q (biases pre-scaled)
    q = _mm(x, wq_ref[...]) * scale                 # (S, H*Dh) f32
    k = _mm(x, wk_ref[...])
    v = _mm(x, wv_ref[...])
    kr = kr_ref[...]                                # (P, H*Dh) f32, P = 2*S

    head_outs = []
    for hh in range(n_head):
        sl = slice(hh * d_head, (hh + 1) * d_head)
        qh, kh, vh, krh = q[:, sl], k[:, sl], v[:, sl], kr[:, sl]
        rw = rw_ref[hh:hh + 1, :]                   # (1, Dh), pre-scaled
        rr = rr_ref[hh:hh + 1, :]
        rs = rs_ref[hh:hh + 1, :]
        seg = seg_ref[hh]                           # (2, Dh)

        # content term (XLNet "ac")
        ac = _mm_nt(qh + rw, kh)                    # (S, S)

        # position term (XLNet "bd"): bd[i, j] = (q[i]+rr) . kr[s + j - i]
        # rel_shift realised as S static-window row matmuls -> no O(S^3) select.
        qrr = qh + rr
        rows = []
        for i in range(s):
            rows.append(_mm_nt(qrr[i:i + 1, :], krh[s - i:2 * s - i, :]))  # (1, S)
        bd = jnp.concatenate(rows, axis=0)          # (S, S)

        # segment term (XLNet "ef") on the MXU, then a (S,S) select
        ef_cols = _mm_nt(qh + rs, seg)              # (S, 2)
        ef = jnp.where(segdiff, ef_cols[:, 1:2], ef_cols[:, 0:1])

        score = ac + bd + ef + mask_add             # already scaled via q/biases
        score = score - jnp.max(score, axis=-1, keepdims=True)
        num = jnp.exp(score)
        probs = num * pl.reciprocal(jnp.sum(num, axis=-1, keepdims=True),
                                    approx=True)
        head_outs.append(_mm(probs, vh))            # (S, Dh)

    attn = jnp.concatenate(head_outs, axis=-1)      # (S, H*Dh) lane-dense

    # output projection + residual + LayerNorm (f32)
    h1 = _layernorm(x + _mm(attn, wo_ref[...]), ln1g_ref[...], ln1b_ref[...])

    # position-wise FFN + residual + LayerNorm (f32 elementwise, bf16 matmuls)
    mid = _gelu(_mm(h1, w1_ref[...]) + b1_ref[...])
    h2 = _layernorm(h1 + _mm(mid, w2_ref[...]) + b2_ref[...],
                    ln2g_ref[...], ln2b_ref[...])
    o_ref[0] = h2


def pallas_xlnet_layer(h, pad_row, tt_row, tt_col, kr, lp):
    b, s, d = h.shape
    n_head, d_head = lp['r_w_bias'].shape
    hd = n_head * d_head
    p_len = kr.shape[0]
    d_inner = lp['ffn_w1'].shape[1]

    def bcast(shape):
        zeros = (0,) * len(shape)
        return pl.BlockSpec(shape, lambda bi, z=zeros: z)

    return pl.pallas_call(
        _xlnet_layer_kernel,
        out_shape=jax.ShapeDtypeStruct((b, s, d), jnp.float32),
        grid=(b,),
        in_specs=[
            pl.BlockSpec((1, s, d), lambda bi: (bi, 0, 0)),   # x
            pl.BlockSpec((1, 1, s), lambda bi: (bi, 0, 0)),   # pad row
            pl.BlockSpec((1, 1, s), lambda bi: (bi, 0, 0)),   # token type (row)
            pl.BlockSpec((1, s, 1), lambda bi: (bi, 0, 0)),   # token type (col)
            bcast((p_len, hd)),                               # kr
            bcast((d, hd)), bcast((d, hd)), bcast((d, hd)),   # wq, wk, wv
            bcast((hd, d)),                                   # wo
            bcast((n_head, d_head)), bcast((n_head, d_head)), bcast((n_head, d_head)),
            bcast((n_head, 2, d_head)),                       # seg_embed
            bcast((1, d)), bcast((1, d)),                     # ln1 gamma, beta
            bcast((d, d_inner)), bcast((1, d_inner)),         # ffn w1, b1
            bcast((d_inner, d)), bcast((1, d)),               # ffn w2, b2
            bcast((1, d)), bcast((1, d)),                     # ln2 gamma, beta
        ],
        out_specs=pl.BlockSpec((1, s, d), lambda bi: (bi, 0, 0)),
        compiler_params=pltpu.CompilerParams(
            dimension_semantics=("parallel",)),
    )(h, pad_row, tt_row, tt_col, kr,
      lp['wq'], lp['wk'], lp['wv'], lp['wo'],
      lp['r_w_bias'], lp['r_r_bias'], lp['r_s_bias'], lp['seg_embed'],
      lp['ln1_g'], lp['ln1_b'],
      lp['ffn_w1'], lp['ffn_b1'], lp['ffn_w2'], lp['ffn_b2'],
      lp['ln2_g'], lp['ln2_b'])


# --------------------------------------------------------------------------
# positional projection kr_l = pos_emb @ W_r^(l), all layers in one call
# --------------------------------------------------------------------------

def _posproj_kernel(pos_ref, wr_ref, o_ref):
    o_ref[0] = jnp.dot(pos_ref[...], wr_ref[0],
                       preferred_element_type=jnp.float32)


def pallas_pos_proj(pos_emb_bf16, wr_all):
    n_layer, d, m = wr_all.shape
    p = pos_emb_bf16.shape[0]
    return pl.pallas_call(
        _posproj_kernel,
        out_shape=jax.ShapeDtypeStruct((n_layer, p, m), jnp.float32),
        grid=(n_layer,),
        in_specs=[pl.BlockSpec((p, d), lambda li: (0, 0)),
                  pl.BlockSpec((1, d, m), lambda li: (li, 0, 0))],
        out_specs=pl.BlockSpec((1, p, m), lambda li: (li, 0, 0)),
        compiler_params=pltpu.CompilerParams(
            dimension_semantics=("parallel",)),
    )(pos_emb_bf16, wr_all)


# --------------------------------------------------------------------------
# classification head: tanh(last @ Ws + bs) @ Wf + bf
# --------------------------------------------------------------------------

def _head_kernel(x_ref, ws_ref, bs_ref, wf_ref, bf_ref, o_ref):
    pooled = jnp.tanh(_mm(x_ref[...], ws_ref[...]) + bs_ref[...])
    o_ref[...] = _mm(pooled, wf_ref[...]) + bf_ref[...]


def pallas_head(x, ws, bs, wf, bf):
    b, d = x.shape
    c = wf.shape[1]
    return pl.pallas_call(
        _head_kernel,
        out_shape=jax.ShapeDtypeStruct((b, c), jnp.float32),
        grid=(1,),
        in_specs=[pl.BlockSpec((b, d), lambda i: (0, 0)),
                  pl.BlockSpec((d, d), lambda i: (0, 0)),
                  pl.BlockSpec((1, d), lambda i: (0, 0)),
                  pl.BlockSpec((d, c), lambda i: (0, 0)),
                  pl.BlockSpec((1, c), lambda i: (0, 0))],
        out_specs=pl.BlockSpec((b, c), lambda i: (0, 0)),
    )(x, ws, bs, wf, bf)


# --------------------------------------------------------------------------
# Parameters & forward pass (glue in plain JAX, hot paths in Pallas)
# --------------------------------------------------------------------------

def init_params(key, vocab, d_model, n_head, d_head, d_inner, n_layer, n_classes):
    keys = jax.random.split(key, 3 + n_layer)
    bf16 = jnp.bfloat16
    scale = 1.0 / math.sqrt(d_head)

    def nrm(k, shape):
        return 0.02 * jax.random.normal(k, shape, jnp.float32)

    params = {
        'word_emb': nrm(keys[0], (vocab, d_model)),
        'summary_w': nrm(keys[1], (d_model, d_model)).astype(bf16),
        'summary_b': jnp.zeros((1, d_model), jnp.float32),
        'fc_w': nrm(keys[2], (d_model, n_classes)).astype(bf16),
        'fc_b': jnp.zeros((1, n_classes), jnp.float32),
        'layers': [],
    }
    wr_list = []
    for l in range(n_layer):
        lk = jax.random.split(keys[3 + l], 11)
        wr_list.append(nrm(lk[3], (d_model, n_head * d_head)).astype(bf16))
        params['layers'].append({
            'wq': nrm(lk[0], (d_model, n_head * d_head)).astype(bf16),
            'wk': nrm(lk[1], (d_model, n_head * d_head)).astype(bf16),
            'wv': nrm(lk[2], (d_model, n_head * d_head)).astype(bf16),
            'wo': nrm(lk[4], (n_head * d_head, d_model)).astype(bf16),
            # 1/sqrt(d_head) attention scale folded into the relative biases
            'r_w_bias': nrm(lk[5], (n_head, d_head)) * scale,
            'r_r_bias': nrm(lk[6], (n_head, d_head)) * scale,
            'r_s_bias': nrm(lk[7], (n_head, d_head)) * scale,
            'seg_embed': nrm(lk[8], (n_head, 2, d_head)),
            'ln1_g': jnp.ones((1, d_model), jnp.float32),
            'ln1_b': jnp.zeros((1, d_model), jnp.float32),
            'ffn_w1': nrm(lk[9], (d_model, d_inner)).astype(bf16),
            'ffn_b1': jnp.zeros((1, d_inner), jnp.float32),
            'ffn_w2': nrm(lk[10], (d_inner, d_model)).astype(bf16),
            'ffn_b2': jnp.zeros((1, d_model), jnp.float32),
            'ln2_g': jnp.ones((1, d_model), jnp.float32),
            'ln2_b': jnp.zeros((1, d_model), jnp.float32),
        })
    params['wr_all'] = jnp.stack(wr_list, axis=0)     # (L, D, H*Dh) bf16
    return params


def model_forward(params, context, mask, token_type_ids):
    b, s = context.shape
    d = params['word_emb'].shape[1]

    # word embedding lookup (gather) -- glue in plain JAX
    h = params['word_emb'][context]                                  # (B, S, D)

    # per-batch key-padding / segment vectors; (S,S) structures are built in-kernel
    pad_row = (1.0 - mask.astype(jnp.float32)).reshape(b, 1, s)
    tt_f = token_type_ids.astype(jnp.float32)
    tt_row = tt_f.reshape(b, 1, s)
    tt_col = tt_f.reshape(b, s, 1)

    # relative sinusoidal positional encoding, projected once for all layers
    pos_seq = jnp.arange(s, -s, -1, dtype=jnp.float32)
    inv_freq = 1.0 / (10000.0 ** (jnp.arange(0, d, 2, dtype=jnp.float32) / d))
    sinu = pos_seq[:, None] * inv_freq[None, :]
    pos_emb = jnp.concatenate([jnp.sin(sinu), jnp.cos(sinu)], axis=-1)  # (P, D)
    kr_all = pallas_pos_proj(pos_emb.astype(jnp.bfloat16),
                             params['wr_all'])                          # (L, P, H*Dh)

    for li, lp in enumerate(params['layers']):
        h = pallas_xlnet_layer(h, pad_row, tt_row, tt_col, kr_all[li], lp)

    # XLNet SequenceSummary(summary_type='last') -> "pooled", then fc(hidden, num_classes)
    last = h[:, -1, :]                                               # (B, D)
    logits = pallas_head(last, params['summary_w'], params['summary_b'],
                         params['fc_w'], params['fc_b'])             # (B, C)
    return logits


# --------------------------------------------------------------------------

if __name__ == "__main__":
    B, S = 2, 8
    VOCAB, D_MODEL, N_HEAD, D_HEAD, D_INNER, N_LAYER, N_CLASSES = 100, 32, 2, 16, 64, 2, 3

    key = jax.random.PRNGKey(0)
    pkey, ckey = jax.random.split(key, 2)
    params = init_params(pkey, VOCAB, D_MODEL, N_HEAD, D_HEAD, D_INNER, N_LAYER, N_CLASSES)

    context = jax.random.randint(ckey, (B, S), 0, VOCAB, dtype=jnp.int32)
    mask = jnp.array([[1, 1, 1, 1, 1, 1, 1, 1],
                      [1, 1, 1, 1, 1, 0, 0, 0]], dtype=jnp.float32)
    token_type_ids = jnp.array([[0, 0, 0, 0, 1, 1, 1, 1],
                                [0, 0, 0, 1, 1, 0, 0, 0]], dtype=jnp.int32)

    fwd = jax.jit(lambda c, m, t: model_forward(params, c, m, t))
    out = fwd(context, mask, token_type_ids)
    out = jax.block_until_ready(out)
    assert out.shape == (B, N_CLASSES)
    assert bool(jnp.all(jnp.isfinite(out)))
    print("KERNEL_OK")
</pallas_src>

<mosaic_0001>
module attributes {stable_mosaic.version = 11 : i64} {
  func.func @_posproj_kernel(%arg0: i32, %arg1: memref<16x32xbf16, #tpu.memory_space<vmem>>, %arg2: memref<1x32x32xbf16, #tpu.memory_space<vmem>>, %arg3: memref<1x16x32xf32, #tpu.memory_space<vmem>>) attributes {dimension_semantics = [#tpu.dimension_semantics<parallel>], iteration_bounds = array<i64: 2>, scalar_prefetch = 0 : i64, scratch_operands = 0 : i64, tpu.core_type = #tpu.core_type<tc>, window_params = [{pipeline_mode = #tpu.pipeline_mode<synchronous>, transform_indices = @transform_0, window_bounds = array<i64: 16, 32>}, {transform_indices = @transform_1, window_bounds = array<i64: 1, 32, 32>}, {transform_indices = @transform_2, window_bounds = array<i64: 1, 16, 32>}]} {
    %c0 = arith.constant 0 : index
    %c0_0 = arith.constant 0 : index
    %0 = vector.load %arg1[%c0, %c0_0] : memref<16x32xbf16, #tpu.memory_space<vmem>>, vector<16x32xbf16>
    %c0_1 = arith.constant 0 : index
    %c0_2 = arith.constant 0 : index
    %c0_3 = arith.constant 0 : index
    %1 = vector.load %arg2[%c0_1, %c0_2, %c0_3] : memref<1x32x32xbf16, #tpu.memory_space<vmem>>, vector<1x32x32xbf16>
    %2 = vector.shape_cast %1 : vector<1x32x32xbf16> to vector<32x32xbf16>
    %cst = arith.constant dense<0.000000e+00> : vector<16x32xf32>
    %3 = tpu.matmul %0, %2, %cst {dimension_numbers = #tpu.dot_dimension_numbers<[1], [0], [0], [1], [0, 0, 1, 1], [], []>} : vector<16x32xbf16>, vector<32x32xbf16>, vector<16x32xf32> -> vector<16x32xf32>
    %c0_4 = arith.constant 0 : index
    %c0_5 = arith.constant 0 : index
    %c0_6 = arith.constant 0 : index
    %4 = vector.load %arg3[%c0_4, %c0_5, %c0_6] : memref<1x16x32xf32, #tpu.memory_space<vmem>>, vector<1x16x32xf32>
    %5 = vector.shape_cast %4 : vector<1x16x32xf32> to vector<16x32xf32>
    %6 = vector.shape_cast %3 : vector<16x32xf32> to vector<1x16x32xf32>
    tpu.vector_store %arg3[%c0_4, %c0_5, %c0_6], %6 {strides = array<i32>} : memref<1x16x32xf32, #tpu.memory_space<vmem>>, vector<1x16x32xf32>,
    return
  }
  func.func @transform_0(%arg0: i32) -> (i32, i32) {
    %c0_i32 = arith.constant 0 : i32
    %c0_i32_0 = arith.constant 0 : i32
    %c0_i32_1 = arith.constant 0 : i32
    return %c0_i32, %c0_i32_0 : i32, i32
  }
  func.func @transform_1(%arg0: i32) -> (i32, i32, i32) {
    %c0_i32 = arith.constant 0 : i32
    %c0_i32_0 = arith.constant 0 : i32
    %c0_i32_1 = arith.constant 0 : i32
    return %arg0, %c0_i32, %c0_i32_0 : i32, i32, i32
  }
  func.func @transform_2(%arg0: i32) -> (i32, i32, i32) {
    %c0_i32 = arith.constant 0 : i32
    %c0_i32_0 = arith.constant 0 : i32
    %c0_i32_1 = arith.constant 0 : i32
    return %arg0, %c0_i32, %c0_i32_0 : i32, i32, i32
  }
}

module attributes {stable_mosaic.version = 11 : i64} {
  func.func @_xlnet_layer_kernel(%arg0: i32, %arg1: memref<1x8x32xf32, #tpu.memory_space<vmem>>, %arg2: memref<1x1x8xf32, #tpu.memory_space<vmem>>, %arg3: memref<1x1x8xf32, #tpu.memory_space<vmem>>, %arg4: memref<1x8x1xf32, #tpu.memory_space<vmem>>, %arg5: memref<16x32xf32, #tpu.memory_space<vmem>>, %arg6: memref<32x32xbf16, #tpu.memory_space<vmem>>, %arg7: memref<32x32xbf16, #tpu.memory_space<vmem>>, %arg8: memref<32x32xbf16, #tpu.memory_space<vmem>>, %arg9: memref<32x32xbf16, #tpu.memory_space<vmem>>, %arg10: memref<2x16xf32, #tpu.memory_space<vmem>>, %arg11: memref<2x16xf32, #tpu.memory_space<vmem>>, %arg12: memref<2x16xf32, #tpu.memory_space<vmem>>, %arg13: memref<2x2x16xf32, #tpu.memory_space<vmem>>, %arg14: memref<1x32xf32, #tpu.memory_space<vmem>>, %arg15: memref<1x32xf32, #tpu.memory_space<vmem>>, %arg16: memref<32x64xbf16, #tpu.memory_space<vmem>>, %arg17: memref<1x64xf32, #tpu.memory_space<vmem>>, %arg18: memref<64x32xbf16, #tpu.memory_space<vmem>>, %arg19: memref<1x32xf32, #tpu.memory_space<vmem>>, %arg20: memref<1x32xf32, #tpu.memory_space<vmem>>, %arg21: memref<1x32xf32, #tpu.memory_space<vmem>>, %arg22: memref<1x8x32xf32, #tpu.memory_space<vmem>>) attributes {dimension_semantics = [#tpu.dimension_semantics<parallel>], iteration_bounds = array<i64: 2>, scalar_prefetch = 0 : i64, scratch_operands = 0 : i64, tpu.core_type = #tpu.core_type<tc>, window_params = [{transform_indices = @transform_0, window_bounds = array<i64: 1, 8, 32>}, {transform_indices = @transform_1, window_bounds = array<i64: 1, 1, 8>}, {transform_indices = @transform_2, window_bounds = array<i64: 1, 1, 8>}, {transform_indices = @transform_3, window_bounds = array<i64: 1, 8, 1>}, {pipeline_mode = #tpu.pipeline_mode<synchronous>, transform_indices = @transform_4, window_bounds = array<i64: 16, 32>}, {pipeline_mode = #tpu.pipeline_mode<synchronous>, transform_indices = @transform_5, window_bounds = array<i64: 32, 32>}, {pipeline_mode = #tpu.pipeline_mode<synchronous>, transform_indices = @transform_6, window_bounds = array<i64: 32, 32>}, {pipeline_mode = #tpu.pipeline_mode<synchronous>, transform_indices = @transform_7, window_bounds = array<i64: 32, 32>}, {pipeline_mode = #tpu.pipeline_mode<synchronous>, transform_indices = @transform_8, window_bounds = array<i64: 32, 32>}, {pipeline_mode = #tpu.pipeline_mode<synchronous>, transform_indices = @transform_9, window_bounds = array<i64: 2, 16>}, {pipeline_mode = #tpu.pipeline_mode<synchronous>, transform_indices = @transform_10, window_bounds = array<i64: 2, 16>}, {pipeline_mode = #tpu.pipeline_mode<synchronous>, transform_indices = @transform_11, window_bounds = array<i64: 2, 16>}, {pipeline_mode = #tpu.pipeline_mode<synchronous>, transform_indices = @transform_12, window_bounds = array<i64: 2, 2, 16>}, {pipeline_mode = #tpu.pipeline_mode<synchronous>, transform_indices = @transform_13, window_bounds = array<i64: 1, 32>}, {pipeline_mode = #tpu.pipeline_mode<synchronous>, transform_indices = @transform_14, window_bounds = array<i64: 1, 32>}, {pipeline_mode = #tpu.pipeline_mode<synchronous>, transform_indices = @transform_15, window_bounds = array<i64: 32, 64>}, {pipeline_mode = #tpu.pipeline_mode<synchronous>, transform_indices = @transform_16, window_bounds = array<i64: 1, 64>}, {pipeline_mode = #tpu.pipeline_mode<synchronous>, transform_indices = @transform_17, window_bounds = array<i64: 64, 32>}, {pipeline_mode = #tpu.pipeline_mode<synchronous>, transform_indices = @transform_18, window_bounds = array<i64: 1, 32>}, {pipeline_mode = #tpu.pipeline_mode<synchronous>, transform_indices = @transform_19, window_bounds = array<i64: 1, 32>}, {pipeline_mode = #tpu.pipeline_mode<synchronous>, transform_indices = @transform_20, window_bounds = array<i64: 1, 32>}, {transform_indices = @transform_21, window_bounds = array<i64: 1, 8, 32>}]} {
    %c0 = arith.constant 0 : index
    %c0_0 = arith.constant 0 : index
    %c0_1 = arith.constant 0 : index
    %0 = vector.load %arg1[%c0, %c0_0, %c0_1] : memref<1x8x32xf32, #tpu.memory_space<vmem>>, vector<1x8x32xf32>
    %1 = vector.shape_cast %0 : vector<1x8x32xf32> to vector<8x32xf32>
    %c0_2 = arith.constant 0 : index
    %c0_3 = arith.constant 0 : index
    %c0_4 = arith.constant 0 : index
    %2 = vector.load %arg2[%c0_2, %c0_3, %c0_4] : memref<1x1x8xf32, #tpu.memory_space<vmem>>, vector<1x1x8xf32>
    %3 = vector.shape_cast %2 : vector<1x1x8xf32> to vector<1x8xf32>
    %4 = tpu.iota {dimensions = array<i32: 0>} : vector<8x8xi32>
    %5 = tpu.iota {dimensions = array<i32: 1>} : vector<8x8xi32>
    %cst = arith.constant 5.000000e-01 : f32
    %6 = vector.broadcast %cst : f32 to vector<1x8xf32>
    %7 = arith.cmpf ogt, %3, %6 : vector<1x8xf32>
    %8 = arith.cmpi ne, %4, %5 : vector<8x8xi32>
    %9 = vector.broadcast %7 : vector<1x8xi1> to vector<8x8xi1>
    %10 = arith.andi %9, %8 : vector<8x8xi1>
    %cst_5 = arith.constant -1.000000e+30 : f32
    %cst_6 = arith.constant 0.000000e+00 : f32
    %11 = vector.broadcast %cst_5 : f32 to vector<8x8xf32>
    %12 = vector.broadcast %cst_6 : f32 to vector<8x8xf32>
    %13 = arith.select %10, %11, %12 : vector<8x8xi1>, vector<8x8xf32>
    %c0_7 = arith.constant 0 : index
    %c0_8 = arith.constant 0 : index
    %c0_9 = arith.constant 0 : index
    %14 = vector.load %arg4[%c0_7, %c0_8, %c0_9] : memref<1x8x1xf32, #tpu.memory_space<vmem>>, vector<1x8x1xf32>
    %15 = vector.shape_cast %14 : vector<1x8x1xf32> to vector<8x1xf32>
    %c0_10 = arith.constant 0 : index
    %c0_11 = arith.constant 0 : index
    %c0_12 = arith.constant 0 : index
    %16 = vector.load %arg3[%c0_10, %c0_11, %c0_12] : memref<1x1x8xf32, #tpu.memory_space<vmem>>, vector<1x1x8xf32>
    %17 = vector.shape_cast %16 : vector<1x1x8xf32> to vector<1x8xf32>
    %18 = vector.broadcast %15 : vector<8x1xf32> to vector<8x8xf32>
    %19 = vector.broadcast %17 : vector<1x8xf32> to vector<8x8xf32>
    %20 = arith.cmpf one, %18, %19 : vector<8x8xf32>
    %c0_13 = arith.constant 0 : index
    %c0_14 = arith.constant 0 : index
    %21 = vector.load %arg6[%c0_13, %c0_14] : memref<32x32xbf16, #tpu.memory_space<vmem>>, vector<32x32xbf16>
    %22 = arith.truncf %1 : vector<8x32xf32> to vector<8x32xbf16>
    %cst_15 = arith.constant dense<0.000000e+00> : vector<8x32xf32>
    %23 = tpu.matmul %22, %21, %cst_15 {dimension_numbers = #tpu.dot_dimension_numbers<[1], [0], [0], [1], [0, 0, 1, 1], [], []>} : vector<8x32xbf16>, vector<32x32xbf16>, vector<8x32xf32> -> vector<8x32xf32>
    %cst_16 = arith.constant 2.500000e-01 : f32
    %24 = vector.broadcast %cst_16 : f32 to vector<8x32xf32>
    %25 = arith.mulf %23, %24 : vector<8x32xf32>
    %c0_17 = arith.constant 0 : index
    %c0_18 = arith.constant 0 : index
    %26 = vector.load %arg7[%c0_17, %c0_18] : memref<32x32xbf16, #tpu.memory_space<vmem>>, vector<32x32xbf16>
    %27 = arith.truncf %1 : vector<8x32xf32> to vector<8x32xbf16>
    %cst_19 = arith.constant dense<0.000000e+00> : vector<8x32xf32>
    %28 = tpu.matmul %27, %26, %cst_19 {dimension_numbers = #tpu.dot_dimension_numbers<[1], [0], [0], [1], [0, 0, 1, 1], [], []>} : vector<8x32xbf16>, vector<32x32xbf16>, vector<8x32xf32> -> vector<8x32xf32>
    %c0_20 = arith.constant 0 : index
    %c0_21 = arith.constant 0 : index
    %29 = vector.load %arg8[%c0_20, %c0_21] : memref<32x32xbf16, #tpu.memory_space<vmem>>, vector<32x32xbf16>
    %30 = arith.truncf %1 : vector<8x32xf32> to vector<8x32xbf16>
    %cst_22 = arith.constant dense<0.000000e+00> : vector<8x32xf32>
    %31 = tpu.matmul %30, %29, %cst_22 {dimension_numbers = #tpu.dot_dimension_numbers<[1], [0], [0], [1], [0, 0, 1, 1], [], []>} : vector<8x32xbf16>, vector<32x32xbf16>, vector<8x32xf32> -> vector<8x32xf32>
    %c0_23 = arith.constant 0 : index
    %c0_24 = arith.constant 0 : index
    %32 = vector.load %arg5[%c0_23, %c0_24] : memref<16x32xf32, #tpu.memory_space<vmem>>, vector<16x32xf32>
    %33 = vector.extract_strided_slice %25 {offsets = [0, 0], sizes = [8, 16], strides = [1, 1]} : vector<8x32xf32> to vector<8x16xf32>
    %34 = vector.extract_strided_slice %28 {offsets = [0, 0], sizes = [8, 16], strides = [1, 1]} : vector<8x32xf32> to vector<8x16xf32>
    %35 = vector.extract_strided_slice %31 {offsets = [0, 0], sizes = [8, 16], strides = [1, 1]} : vector<8x32xf32> to vector<8x16xf32>
    %36 = vector.extract_strided_slice %32 {offsets = [0, 0], sizes = [16, 16], strides = [1, 1]} : vector<16x32xf32> to vector<16x16xf32>
    %c0_25 = arith.constant 0 : index
    %c0_26 = arith.constant 0 : index
    %37 = vector.load %arg10[%c0_25, %c0_26] : memref<2x16xf32, #tpu.memory_space<vmem>>, vector<1x16xf32>
    %c0_27 = arith.constant 0 : index
    %c0_28 = arith.constant 0 : index
    %38 = vector.load %arg11[%c0_27, %c0_28] : memref<2x16xf32, #tpu.memory_space<vmem>>, vector<1x16xf32>
    %c0_29 = arith.constant 0 : index
    %c0_30 = arith.constant 0 : index
    %39 = vector.load %arg12[%c0_29, %c0_30] : memref<2x16xf32, #tpu.memory_space<vmem>>, vector<1x16xf32>
    %c0_31 = arith.constant 0 : index
    %c0_32 = arith.constant 0 : index
    %c0_33 = arith.constant 0 : index
    %40 = vector.load %arg13[%c0_31, %c0_32, %c0_33] : memref<2x2x16xf32, #tpu.memory_space<vmem>>, vector<1x2x16xf32>
    %41 = vector.shape_cast %40 : vector<1x2x16xf32> to vector<2x16xf32>
    %42 = vector.broadcast %37 : vector<1x16xf32> to vector<8x16xf32>
    %43 = arith.addf %33, %42 : vector<8x16xf32>
    %44 = arith.truncf %43 : vector<8x16xf32> to vector<8x16xbf16>
    %45 = arith.truncf %34 : vector<8x16xf32> to vector<8x16xbf16>
    %cst_34 = arith.constant dense<0.000000e+00> : vector<8x8xf32>
    %46 = tpu.matmul %44, %45, %cst_34 {dimension_numbers = #tpu.dot_dimension_numbers<[1], [1], [0], [0], [0, 0, 1, 0], [], []>} : vector<8x16xbf16>, vector<8x16xbf16>, vector<8x8xf32> -> vector<8x8xf32>
    %47 = vector.broadcast %38 : vector<1x16xf32> to vector<8x16xf32>
    %48 = arith.addf %33, %47 : vector<8x16xf32>
    %49 = vector.extract_strided_slice %48 {offsets = [0, 0], sizes = [1, 16], strides = [1, 1]} : vector<8x16xf32> to vector<1x16xf32>
    %50 = vector.extract_strided_slice %36 {offsets = [8, 0], sizes = [8, 16], strides = [1, 1]} : vector<16x16xf32> to vector<8x16xf32>
    %51 = arith.truncf %49 : vector<1x16xf32> to vector<1x16xbf16>
    %52 = arith.truncf %50 : vector<8x16xf32> to vector<8x16xbf16>
    %cst_35 = arith.constant dense<0.000000e+00> : vector<1x8xf32>
    %53 = tpu.matmul %51, %52, %cst_35 {dimension_numbers = #tpu.dot_dimension_numbers<[1], [1], [0], [0], [0, 0, 1, 0], [], []>} : vector<1x16xbf16>, vector<8x16xbf16>, vector<1x8xf32> -> vector<1x8xf32>
    %54 = vector.extract_strided_slice %48 {offsets = [1, 0], sizes = [1, 16], strides = [1, 1]} : vector<8x16xf32> to vector<1x16xf32>
    %55 = vector.extract_strided_slice %36 {offsets = [7, 0], sizes = [8, 16], strides = [1, 1]} : vector<16x16xf32> to vector<8x16xf32>
    %56 = arith.truncf %54 : vector<1x16xf32> to vector<1x16xbf16>
    %57 = arith.truncf %55 : vector<8x16xf32> to vector<8x16xbf16>
    %cst_36 = arith.constant dense<0.000000e+00> : vector<1x8xf32>
    %58 = tpu.matmul %56, %57, %cst_36 {dimension_numbers = #tpu.dot_dimension_numbers<[1], [1], [0], [0], [0, 0, 1, 0], [], []>} : vector<1x16xbf16>, vector<8x16xbf16>, vector<1x8xf32> -> vector<1x8xf32>
    %59 = vector.extract_strided_slice %48 {offsets = [2, 0], sizes = [1, 16], strides = [1, 1]} : vector<8x16xf32> to vector<1x16xf32>
    %60 = vector.extract_strided_slice %36 {offsets = [6, 0], sizes = [8, 16], strides = [1, 1]} : vector<16x16xf32> to vector<8x16xf32>
    %61 = arith.truncf %59 : vector<1x16xf32> to vector<1x16xbf16>
    %62 = arith.truncf %60 : vector<8x16xf32> to vector<8x16xbf16>
    %cst_37 = arith.constant dense<0.000000e+00> : vector<1x8xf32>
    %63 = tpu.matmul %61, %62, %cst_37 {dimension_numbers = #tpu.dot_dimension_numbers<[1], [1], [0], [0], [0, 0, 1, 0], [], []>} : vector<1x16xbf16>, vector<8x16xbf16>, vector<1x8xf32> -> vector<1x8xf32>
    %64 = vector.extract_strided_slice %48 {offsets = [3, 0], sizes = [1, 16], strides = [1, 1]} : vector<8x16xf32> to vector<1x16xf32>
    %65 = vector.extract_strided_slice %36 {offsets = [5, 0], sizes = [8, 16], strides = [1, 1]} : vector<16x16xf32> to vector<8x16xf32>
    %66 = arith.truncf %64 : vector<1x16xf32> to vector<1x16xbf16>
    %67 = arith.truncf %65 : vector<8x16xf32> to vector<8x16xbf16>
    %cst_38 = arith.constant dense<0.000000e+00> : vector<1x8xf32>
    %68 = tpu.matmul %66, %67, %cst_38 {dimension_numbers = #tpu.dot_dimension_numbers<[1], [1], [0], [0], [0, 0, 1, 0], [], []>} : vector<1x16xbf16>, vector<8x16xbf16>, vector<1x8xf32> -> vector<1x8xf32>
    %69 = vector.extract_strided_slice %48 {offsets = [4, 0], sizes = [1, 16], strides = [1, 1]} : vector<8x16xf32> to vector<1x16xf32>
    %70 = vector.extract_strided_slice %36 {offsets = [4, 0], sizes = [8, 16], strides = [1, 1]} : vector<16x16xf32> to vector<8x16xf32>
    %71 = arith.truncf %69 : vector<1x16xf32> to vector<1x16xbf16>
    %72 = arith.truncf %70 : vector<8x16xf32> to vector<8x16xbf16>
    %cst_39 = arith.constant dense<0.000000e+00> : vector<1x8xf32>
    %73 = tpu.matmul %71, %72, %cst_39 {dimension_numbers = #tpu.dot_dimension_numbers<[1], [1], [0], [0], [0, 0, 1, 0], [], []>} : vector<1x16xbf16>, vector<8x16xbf16>, vector<1x8xf32> -> vector<1x8xf32>
    %74 = vector.extract_strided_slice %48 {offsets = [5, 0], sizes = [1, 16], strides = [1, 1]} : vector<8x16xf32> to vector<1x16xf32>
    %75 = vector.extract_strided_slice %36 {offsets = [3, 0], sizes = [8, 16], strides = [1, 1]} : vector<16x16xf32> to vector<8x16xf32>
    %76 = arith.truncf %74 : vector<1x16xf32> to vector<1x16xbf16>
    %77 = arith.truncf %75 : vector<8x16xf32> to vector<8x16xbf16>
    %cst_40 = arith.constant dense<0.000000e+00> : vector<1x8xf32>
    %78 = tpu.matmul %76, %77, %cst_40 {dimension_numbers = #tpu.dot_dimension_numbers<[1], [1], [0], [0], [0, 0, 1, 0], [], []>} : vector<1x16xbf16>, vector<8x16xbf16>, vector<1x8xf32> -> vector<1x8xf32>
    %79 = vector.extract_strided_slice %48 {offsets = [6, 0], sizes = [1, 16], strides = [1, 1]} : vector<8x16xf32> to vector<1x16xf32>
    %80 = vector.extract_strided_slice %36 {offsets = [2, 0], sizes = [8, 16], strides = [1, 1]} : vector<16x16xf32> to vector<8x16xf32>
    %81 = arith.truncf %79 : vector<1x16xf32> to vector<1x16xbf16>
    %82 = arith.truncf %80 : vector<8x16xf32> to vector<8x16xbf16>
    %cst_41 = arith.constant dense<0.000000e+00> : vector<1x8xf32>
    %83 = tpu.matmul %81, %82, %cst_41 {dimension_numbers = #tpu.dot_dimension_numbers<[1], [1], [0], [0], [0, 0, 1, 0], [], []>} : vector<1x16xbf16>, vector<8x16xbf16>, vector<1x8xf32> -> vector<1x8xf32>
    %84 = vector.extract_strided_slice %48 {offsets = [7, 0], sizes = [1, 16], strides = [1, 1]} : vector<8x16xf32> to vector<1x16xf32>
    %85 = vector.extract_strided_slice %36 {offsets = [1, 0], sizes = [8, 16], strides = [1, 1]} : vector<16x16xf32> to vector<8x16xf32>
    %86 = arith.truncf %84 : vector<1x16xf32> to vector<1x16xbf16>
    %87 = arith.truncf %85 : vector<8x16xf32> to vector<8x16xbf16>
    %cst_42 = arith.constant dense<0.000000e+00> : vector<1x8xf32>
    %88 = tpu.matmul %86, %87, %cst_42 {dimension_numbers = #tpu.dot_dimension_numbers<[1], [1], [0], [0], [0, 0, 1, 0], [], []>} : vector<1x16xbf16>, vector<8x16xbf16>, vector<1x8xf32> -> vector<1x8xf32>
    %89 = tpu.concatenate %53, %58, %63, %68, %73, %78, %83, %88 in 0 : vector<1x8xf32>, vector<1x8xf32>, vector<1x8xf32>, vector<1x8xf32>, vector<1x8xf32>, vector<1x8xf32>, vector<1x8xf32>, vector<1x8xf32> -> vector<8x8xf32>
    %90 = vector.broadcast %39 : vector<1x16xf32> to vector<8x16xf32>
    %91 = arith.addf %33, %90 : vector<8x16xf32>
    %92 = arith.truncf %91 : vector<8x16xf32> to vector<8x16xbf16>
    %93 = arith.truncf %41 : vector<2x16xf32> to vector<2x16xbf16>
    %cst_43 = arith.constant dense<0.000000e+00> : vector<8x2xf32>
    %94 = tpu.matmul %92, %93, %cst_43 {dimension_numbers = #tpu.dot_dimension_numbers<[1], [1], [0], [0], [0, 0, 1, 0], [], []>} : vector<8x16xbf16>, vector<2x16xbf16>, vector<8x2xf32> -> vector<8x2xf32>
    %95 = vector.extract_strided_slice %94 {offsets = [0, 1], sizes = [8, 1], strides = [1, 1]} : vector<8x2xf32> to vector<8x1xf32>
    %96 = vector.extract_strided_slice %94 {offsets = [0, 0], sizes = [8, 1], strides = [1, 1]} : vector<8x2xf32> to vector<8x1xf32>
    %97 = vector.shape_cast %95 : vector<8x1xf32> to vector<8x1xf32>
    %98 = vector.broadcast %97 : vector<8x1xf32> to vector<8x8xf32>
    %99 = vector.shape_cast %96 : vector<8x1xf32> to vector<8x1xf32>
    %100 = vector.broadcast %99 : vector<8x1xf32> to vector<8x8xf32>
    %101 = arith.select %20, %98, %100 : vector<8x8xi1>, vector<8x8xf32>
    %102 = arith.addf %46, %89 : vector<8x8xf32>
    %103 = arith.addf %102, %101 : vector<8x8xf32>
    %104 = arith.addf %103, %13 : vector<8x8xf32>
    %cst_44 = arith.constant dense<0xFF800000> : vector<8xf32>
    %105 = vector.multi_reduction <maximumf>, %104, %cst_44 [1] : vector<8x8xf32> to vector<8xf32>
    %106 = vector.shape_cast %105 : vector<8xf32> to vector<8x1xf32>
    %107 = vector.broadcast %106 : vector<8x1xf32> to vector<8x8xf32>
    %108 = arith.subf %104, %107 : vector<8x8xf32>
    %109 = math.exp %108 : vector<8x8xf32>
    %cst_45 = arith.constant dense<0.000000e+00> : vector<8xf32>
    %110 = vector.multi_reduction <add>, %109, %cst_45 [1] : vector<8x8xf32> to vector<8xf32>
    %111 = vector.shape_cast %110 : vector<8xf32> to vector<8x1xf32>
    %112 = tpu.reciprocal %111 {approx = true} : vector<8x1xf32> -> vector<8x1xf32>
    %113 = vector.broadcast %112 : vector<8x1xf32> to vector<8x8xf32>
    %114 = arith.mulf %109, %113 : vector<8x8xf32>
    %115 = arith.truncf %114 : vector<8x8xf32> to vector<8x8xbf16>
    %116 = arith.truncf %35 : vector<8x16xf32> to vector<8x16xbf16>
    %cst_46 = arith.constant dense<0.000000e+00> : vector<8x16xf32>
    %117 = tpu.matmul %115, %116, %cst_46 {dimension_numbers = #tpu.dot_dimension_numbers<[1], [0], [0], [1], [0, 0, 1, 1], [], []>} : vector<8x8xbf16>, vector<8x16xbf16>, vector<8x16xf32> -> vector<8x16xf32>
    %118 = vector.extract_strided_slice %25 {offsets = [0, 16], sizes = [8, 16], strides = [1, 1]} : vector<8x32xf32> to vector<8x16xf32>
    %119 = vector.extract_strided_slice %28 {offsets = [0, 16], sizes = [8, 16], strides = [1, 1]} : vector<8x32xf32> to vector<8x16xf32>
    %120 = vector.extract_strided_slice %31 {offsets = [0, 16], sizes = [8, 16], strides = [1, 1]} : vector<8x32xf32> to vector<8x16xf32>
    %121 = vector.extract_strided_slice %32 {offsets = [0, 16], sizes = [16, 16], strides = [1, 1]} : vector<16x32xf32> to vector<16x16xf32>
    %c1 = arith.constant 1 : index
    %c0_47 = arith.constant 0 : index
    %122 = vector.load %arg10[%c1, %c0_47] : memref<2x16xf32, #tpu.memory_space<vmem>>, vector<1x16xf32>
    %c1_48 = arith.constant 1 : index
    %c0_49 = arith.constant 0 : index
    %123 = vector.load %arg11[%c1_48, %c0_49] : memref<2x16xf32, #tpu.memory_space<vmem>>, vector<1x16xf32>
    %c1_50 = arith.constant 1 : index
    %c0_51 = arith.constant 0 : index
    %124 = vector.load %arg12[%c1_50, %c0_51] : memref<2x16xf32, #tpu.memory_space<vmem>>, vector<1x16xf32>
    %c1_52 = arith.constant 1 : index
    %c0_53 = arith.constant 0 : index
    %c0_54 = arith.constant 0 : index
    %125 = vector.load %arg13[%c1_52, %c0_53, %c0_54] : memref<2x2x16xf32, #tpu.memory_space<vmem>>, vector<1x2x16xf32>
    %126 = vector.shape_cast %125 : vector<1x2x16xf32> to vector<2x16xf32>
    %127 = vector.broadcast %122 : vector<1x16xf32> to vector<8x16xf32>
    %128 = arith.addf %118, %127 : vector<8x16xf32>
    %129 = arith.truncf %128 : vector<8x16xf32> to vector<8x16xbf16>
    %130 = arith.truncf %119 : vector<8x16xf32> to vector<8x16xbf16>
    %cst_55 = arith.constant dense<0.000000e+00> : vector<8x8xf32>
    %131 = tpu.matmul %129, %130, %cst_55 {dimension_numbers = #tpu.dot_dimension_numbers<[1], [1], [0], [0], [0, 0, 1, 0], [], []>} : vector<8x16xbf16>, vector<8x16xbf16>, vector<8x8xf32> -> vector<8x8xf32>
    %132 = vector.broadcast %123 : vector<1x16xf32> to vector<8x16xf32>
    %133 = arith.addf %118, %132 : vector<8x16xf32>
    %134 = vector.extract_strided_slice %133 {offsets = [0, 0], sizes = [1, 16], strides = [1, 1]} : vector<8x16xf32> to vector<1x16xf32>
    %135 = vector.extract_strided_slice %121 {offsets = [8, 0], sizes = [8, 16], strides = [1, 1]} : vector<16x16xf32> to vector<8x16xf32>
    %136 = arith.truncf %134 : vector<1x16xf32> to vector<1x16xbf16>
    %137 = arith.truncf %135 : vector<8x16xf32> to vector<8x16xbf16>
    %cst_56 = arith.constant dense<0.000000e+00> : vector<1x8xf32>
    %138 = tpu.matmul %136, %137, %cst_56 {dimension_numbers = #tpu.dot_dimension_numbers<[1], [1], [0], [0], [0, 0, 1, 0], [], []>} : vector<1x16xbf16>, vector<8x16xbf16>, vector<1x8xf32> -> vector<1x8xf32>
    %139 = vector.extract_strided_slice %133 {offsets = [1, 0], sizes = [1, 16], strides = [1, 1]} : vector<8x16xf32> to vector<1x16xf32>
    %140 = vector.extract_strided_slice %121 {offsets = [7, 0], sizes = [8, 16], strides = [1, 1]} : vector<16x16xf32> to vector<8x16xf32>
    %141 = arith.truncf %139 : vector<1x16xf32> to vector<1x16xbf16>
    %142 = arith.truncf %140 : vector<8x16xf32> to vector<8x16xbf16>
    %cst_57 = arith.constant dense<0.000000e+00> : vector<1x8xf32>
    %143 = tpu.matmul %141, %142, %cst_57 {dimension_numbers = #tpu.dot_dimension_numbers<[1], [1], [0], [0], [0, 0, 1, 0], [], []>} : vector<1x16xbf16>, vector<8x16xbf16>, vector<1x8xf32> -> vector<1x8xf32>
    %144 = vector.extract_strided_slice %133 {offsets = [2, 0], sizes = [1, 16], strides = [1, 1]} : vector<8x16xf32> to vector<1x16xf32>
    %145 = vector.extract_strided_slice %121 {offsets = [6, 0], sizes = [8, 16], strides = [1, 1]} : vector<16x16xf32> to vector<8x16xf32>
    %146 = arith.truncf %144 : vector<1x16xf32> to vector<1x16xbf16>
    %147 = arith.truncf %145 : vector<8x16xf32> to vector<8x16xbf16>
    %cst_58 = arith.constant dense<0.000000e+00> : vector<1x8xf32>
    %148 = tpu.matmul %146, %147, %cst_58 {dimension_numbers = #tpu.dot_dimension_numbers<[1], [1], [0], [0], [0, 0, 1, 0], [], []>} : vector<1x16xbf16>, vector<8x16xbf16>, vector<1x8xf32> -> vector<1x8xf32>
    %149 = vector.extract_strided_slice %133 {offsets = [3, 0], sizes = [1, 16], strides = [1, 1]} : vector<8x16xf32> to vector<1x16xf32>
    %150 = vector.extract_strided_slice %121 {offsets = [5, 0], sizes = [8, 16], strides = [1, 1]} : vector<16x16xf32> to vector<8x16xf32>
    %151 = arith.truncf %149 : vector<1x16xf32> to vector<1x16xbf16>
    %152 = arith.truncf %150 : vector<8x16xf32> to vector<8x16xbf16>
    %cst_59 = arith.constant dense<0.000000e+00> : vector<1x8xf32>
    %153 = tpu.matmul %151, %152, %cst_59 {dimension_numbers = #tpu.dot_dimension_numbers<[1], [1], [0], [0], [0, 0, 1, 0], [], []>} : vector<1x16xbf16>, vector<8x16xbf16>, vector<1x8xf32> -> vector<1x8xf32>
    %154 = vector.extract_strided_slice %133 {offsets = [4, 0], sizes = [1, 16], strides = [1, 1]} : vector<8x16xf32> to vector<1x16xf32>
    %155 = vector.extract_strided_slice %121 {offsets = [4, 0], sizes = [8, 16], strides = [1, 1]} : vector<16x16xf32> to vector<8x16xf32>
    %156 = arith.truncf %154 : vector<1x16xf32> to vector<1x16xbf16>
    %157 = arith.truncf %155 : vector<8x16xf32> to vector<8x16xbf16>
    %cst_60 = arith.constant dense<0.000000e+00> : vector<1x8xf32>
    %158 = tpu.matmul %156, %157, %cst_60 {dimension_numbers = #tpu.dot_dimension_numbers<[1], [1], [0], [0], [0, 0, 1, 0], [], []>} : vector<1x16xbf16>, vector<8x16xbf16>, vector<1x8xf32> -> vector<1x8xf32>
    %159 = vector.extract_strided_slice %133 {offsets = [5, 0], sizes = [1, 16], strides = [1, 1]} : vector<8x16xf32> to vector<1x16xf32>
    %160 = vector.extract_strided_slice %121 {offsets = [3, 0], sizes = [8, 16], strides = [1, 1]} : vector<16x16xf32> to vector<8x16xf32>
    %161 = arith.truncf %159 : vector<1x16xf32> to vector<1x16xbf16>
    %162 = arith.truncf %160 : vector<8x16xf32> to vector<8x16xbf16>
    %cst_61 = arith.constant dense<0.000000e+00> : vector<1x8xf32>
    %163 = tpu.matmul %161, %162, %cst_61 {dimension_numbers = #tpu.dot_dimension_numbers<[1], [1], [0], [0], [0, 0, 1, 0], [], []>} : vector<1x16xbf16>, vector<8x16xbf16>, vector<1x8xf32> -> vector<1x8xf32>
    %164 = vector.extract_strided_slice %133 {offsets = [6, 0], sizes = [1, 16], strides = [1, 1]} : vector<8x16xf32> to vector<1x16xf32>
    %165 = vector.extract_strided_slice %121 {offsets = [2, 0], sizes = [8, 16], strides = [1, 1]} : vector<16x16xf32> to vector<8x16xf32>
    %166 = arith.truncf %164 : vector<1x16xf32> to vector<1x16xbf16>
    %167 = arith.truncf %165 : vector<8x16xf32> to vector<8x16xbf16>
    %cst_62 = arith.constant dense<0.000000e+00> : vector<1x8xf32>
    %168 = tpu.matmul %166, %167, %cst_62 {dimension_numbers = #tpu.dot_dimension_numbers<[1], [1], [0], [0], [0, 0, 1, 0], [], []>} : vector<1x16xbf16>, vector<8x16xbf16>, vector<1x8xf32> -> vector<1x8xf32>
    %169 = vector.extract_strided_slice %133 {offsets = [7, 0], sizes = [1, 16], strides = [1, 1]} : vector<8x16xf32> to vector<1x16xf32>
    %170 = vector.extract_strided_slice %121 {offsets = [1, 0], sizes = [8, 16], strides = [1, 1]} : vector<16x16xf32> to vector<8x16xf32>
    %171 = arith.truncf %169 : vector<1x16xf32> to vector<1x16xbf16>
    %172 = arith.truncf %170 : vector<8x16xf32> to vector<8x16xbf16>
    %cst_63 = arith.constant dense<0.000000e+00> : vector<1x8xf32>
    %173 = tpu.matmul %171, %172, %cst_63 {dimension_numbers = #tpu.dot_dimension_numbers<[1], [1], [0], [0], [0, 0, 1, 0], [], []>} : vector<1x16xbf16>, vector<8x16xbf16>, vector<1x8xf32> -> vector<1x8xf32>
    %174 = tpu.concatenate %138, %143, %148, %153, %158, %163, %168, %173 in 0 : vector<1x8xf32>, vector<1x8xf32>, vector<1x8xf32>, vector<1x8xf32>, vector<1x8xf32>, vector<1x8xf32>, vector<1x8xf32>, vector<1x8xf32> -> vector<8x8xf32>
    %175 = vector.broadcast %124 : vector<1x16xf32> to vector<8x16xf32>
    %176 = arith.addf %118, %175 : vector<8x16xf32>
    %177 = arith.truncf %176 : vector<8x16xf32> to vector<8x16xbf16>
    %178 = arith.truncf %126 : vector<2x16xf32> to vector<2x16xbf16>
    %cst_64 = arith.constant dense<0.000000e+00> : vector<8x2xf32>
    %179 = tpu.matmul %177, %178, %cst_64 {dimension_numbers = #tpu.dot_dimension_numbers<[1], [1], [0], [0], [0, 0, 1, 0], [], []>} : vector<8x16xbf16>, vector<2x16xbf16>, vector<8x2xf32> -> vector<8x2xf32>
    %180 = vector.extract_strided_slice %179 {offsets = [0, 1], sizes = [8, 1], strides = [1, 1]} : vector<8x2xf32> to vector<8x1xf32>
    %181 = vector.extract_strided_slice %179 {offsets = [0, 0], sizes = [8, 1], strides = [1, 1]} : vector<8x2xf32> to vector<8x1xf32>
    %182 = vector.shape_cast %180 : vector<8x1xf32> to vector<8x1xf32>
    %183 = vector.broadcast %182 : vector<8x1xf32> to vector<8x8xf32>
    %184 = vector.shape_cast %181 : vector<8x1xf32> to vector<8x1xf32>
    %185 = vector.broadcast %184 : vector<8x1xf32> to vector<8x8xf32>
    %186 = arith.select %20, %183, %185 : vector<8x8xi1>, vector<8x8xf32>
    %187 = arith.addf %131, %174 : vector<8x8xf32>
    %188 = arith.addf %187, %186 : vector<8x8xf32>
    %189 = arith.addf %188, %13 : vector<8x8xf32>
    %cst_65 = arith.constant dense<0xFF800000> : vector<8xf32>
    %190 = vector.multi_reduction <maximumf>, %189, %cst_65 [1] : vector<8x8xf32> to vector<8xf32>
    %191 = vector.shape_cast %190 : vector<8xf32> to vector<8x1xf32>
    %192 = vector.broadcast %191 : vector<8x1xf32> to vector<8x8xf32>
    %193 = arith.subf %189, %192 : vector<8x8xf32>
    %194 = math.exp %193 : vector<8x8xf32>
    %cst_66 = arith.constant dense<0.000000e+00> : vector<8xf32>
    %195 = vector.multi_reduction <add>, %194, %cst_66 [1] : vector<8x8xf32> to vector<8xf32>
    %196 = vector.shape_cast %195 : vector<8xf32> to vector<8x1xf32>
    %197 = tpu.reciprocal %196 {approx = true} : vector<8x1xf32> -> vector<8x1xf32>
    %198 = vector.broadcast %197 : vector<8x1xf32> to vector<8x8xf32>
    %199 = arith.mulf %194, %198 : vector<8x8xf32>
    %200 = arith.truncf %199 : vector<8x8xf32> to vector<8x8xbf16>
    %201 = arith.truncf %120 : vector<8x16xf32> to vector<8x16xbf16>
    %cst_67 = arith.constant dense<0.000000e+00> : vector<8x16xf32>
    %202 = tpu.matmul %200, %201, %cst_67 {dimension_numbers = #tpu.dot_dimension_numbers<[1], [0], [0], [1], [0, 0, 1, 1], [], []>} : vector<8x8xbf16>, vector<8x16xbf16>, vector<8x16xf32> -> vector<8x16xf32>
    %203 = tpu.concatenate %117, %202 in 1 : vector<8x16xf32>, vector<8x16xf32> -> vector<8x32xf32>
    %c0_68 = arith.constant 0 : index
    %c0_69 = arith.constant 0 : index
    %204 = vector.load %arg9[%c0_68, %c0_69] : memref<32x32xbf16, #tpu.memory_space<vmem>>, vector<32x32xbf16>
    %205 = arith.truncf %203 : vector<8x32xf32> to vector<8x32xbf16>
    %cst_70 = arith.constant dense<0.000000e+00> : vector<8x32xf32>
    %206 = tpu.matmul %205, %204, %cst_70 {dimension_numbers = #tpu.dot_dimension_numbers<[1], [0], [0], [1], [0, 0, 1, 1], [], []>} : vector<8x32xbf16>, vector<32x32xbf16>, vector<8x32xf32> -> vector<8x32xf32>
    %207 = arith.addf %1, %206 : vector<8x32xf32>
    %c0_71 = arith.constant 0 : index
    %c0_72 = arith.constant 0 : index
    %208 = vector.load %arg14[%c0_71, %c0_72] : memref<1x32xf32, #tpu.memory_space<vmem>>, vector<1x32xf32>
    %c0_73 = arith.constant 0 : index
    %c0_74 = arith.constant 0 : index
    %209 = vector.load %arg15[%c0_73, %c0_74] : memref<1x32xf32, #tpu.memory_space<vmem>>, vector<1x32xf32>
    %cst_75 = arith.constant dense<0.000000e+00> : vector<8xf32>
    %210 = vector.multi_reduction <add>, %207, %cst_75 [1] : vector<8x32xf32> to vector<8xf32>
    %211 = vector.shape_cast %210 : vector<8xf32> to vector<8x1xf32>
    %cst_76 = arith.constant 3.200000e+01 : f32
    %212 = vector.broadcast %cst_76 : f32 to vector<8x1xf32>
    %213 = arith.divf %211, %212 : vector<8x1xf32>
    %214 = vector.broadcast %213 : vector<8x1xf32> to vector<8x32xf32>
    %215 = arith.subf %207, %214 : vector<8x32xf32>
    %216 = arith.mulf %215, %215 : vector<8x32xf32>
    %cst_77 = arith.constant dense<0.000000e+00> : vector<8xf32>
    %217 = vector.multi_reduction <add>, %216, %cst_77 [1] : vector<8x32xf32> to vector<8xf32>
    %218 = vector.shape_cast %217 : vector<8xf32> to vector<8x1xf32>
    %cst_78 = arith.constant 3.200000e+01 : f32
    %219 = vector.broadcast %cst_78 : f32 to vector<8x1xf32>
    %220 = arith.divf %218, %219 : vector<8x1xf32>
    %221 = vector.broadcast %213 : vector<8x1xf32> to vector<8x32xf32>
    %222 = arith.subf %207, %221 : vector<8x32xf32>
    %cst_79 = arith.constant 9.99999996E-13 : f32
    %223 = vector.broadcast %cst_79 : f32 to vector<8x1xf32>
    %224 = arith.addf %220, %223 : vector<8x1xf32>
    %225 = math.rsqrt %224 : vector<8x1xf32>
    %226 = vector.broadcast %225 : vector<8x1xf32> to vector<8x32xf32>
    %227 = arith.mulf %222, %226 : vector<8x32xf32>
    %228 = vector.broadcast %208 : vector<1x32xf32> to vector<8x32xf32>
    %229 = arith.mulf %227, %228 : vector<8x32xf32>
    %230 = vector.broadcast %209 : vector<1x32xf32> to vector<8x32xf32>
    %231 = arith.addf %229, %230 : vector<8x32xf32>
    %c0_80 = arith.constant 0 : index
    %c0_81 = arith.constant 0 : index
    %232 = vector.load %arg16[%c0_80, %c0_81] : memref<32x64xbf16, #tpu.memory_space<vmem>>, vector<32x64xbf16>
    %233 = arith.truncf %231 : vector<8x32xf32> to vector<8x32xbf16>
    %cst_82 = arith.constant dense<0.000000e+00> : vector<8x64xf32>
    %234 = tpu.matmul %233, %232, %cst_82 {dimension_numbers = #tpu.dot_dimension_numbers<[1], [0], [0], [1], [0, 0, 1, 1], [], []>} : vector<8x32xbf16>, vector<32x64xbf16>, vector<8x64xf32> -> vector<8x64xf32>
    %c0_83 = arith.constant 0 : index
    %c0_84 = arith.constant 0 : index
    %235 = vector.load %arg17[%c0_83, %c0_84] : memref<1x64xf32, #tpu.memory_space<vmem>>, vector<1x64xf32>
    %236 = vector.broadcast %235 : vector<1x64xf32> to vector<8x64xf32>
    %237 = arith.addf %234, %236 : vector<8x64xf32>
    %cst_85 = arith.constant 5.000000e-01 : f32
    %238 = vector.broadcast %cst_85 : f32 to vector<8x64xf32>
    %239 = arith.mulf %238, %237 : vector<8x64xf32>
    %cst_86 = arith.constant 4.471500e-02 : f32
    %240 = vector.broadcast %cst_86 : f32 to vector<8x64xf32>
    %241 = arith.mulf %240, %237 : vector<8x64xf32>
    %242 = arith.mulf %241, %237 : vector<8x64xf32>
    %243 = arith.mulf %242, %237 : vector<8x64xf32>
    %244 = arith.addf %237, %243 : vector<8x64xf32>
    %cst_87 = arith.constant 0.797884583 : f32
    %245 = vector.broadcast %cst_87 : f32 to vector<8x64xf32>
    %246 = arith.mulf %245, %244 : vector<8x64xf32>
    %247 = math.tanh %246 : vector<8x64xf32>
    %cst_88 = arith.constant 1.000000e+00 : f32
    %248 = vector.broadcast %cst_88 : f32 to vector<8x64xf32>
    %249 = arith.addf %248, %247 : vector<8x64xf32>
    %250 = arith.mulf %239, %249 : vector<8x64xf32>
    %c0_89 = arith.constant 0 : index
    %c0_90 = arith.constant 0 : index
    %251 = vector.load %arg18[%c0_89, %c0_90] : memref<64x32xbf16, #tpu.memory_space<vmem>>, vector<64x32xbf16>
    %252 = arith.truncf %250 : vector<8x64xf32> to vector<8x64xbf16>
    %cst_91 = arith.constant dense<0.000000e+00> : vector<8x32xf32>
    %253 = tpu.matmul %252, %251, %cst_91 {dimension_numbers = #tpu.dot_dimension_numbers<[1], [0], [0], [1], [0, 0, 1, 1], [], []>} : vector<8x64xbf16>, vector<64x32xbf16>, vector<8x32xf32> -> vector<8x32xf32>
    %254 = arith.addf %231, %253 : vector<8x32xf32>
    %c0_92 = arith.constant 0 : index
    %c0_93 = arith.constant 0 : index
    %255 = vector.load %arg19[%c0_92, %c0_93] : memref<1x32xf32, #tpu.memory_space<vmem>>, vector<1x32xf32>
    %256 = vector.broadcast %255 : vector<1x32xf32> to vector<8x32xf32>
    %257 = arith.addf %254, %256 : vector<8x32xf32>
    %c0_94 = arith.constant 0 : index
    %c0_95 = arith.constant 0 : index
    %258 = vector.load %arg20[%c0_94, %c0_95] : memref<1x32xf32, #tpu.memory_space<vmem>>, vector<1x32xf32>
    %c0_96 = arith.constant 0 : index
    %c0_97 = arith.constant 0 : index
    %259 = vector.load %arg21[%c0_96, %c0_97] : memref<1x32xf32, #tpu.memory_space<vmem>>, vector<1x32xf32>
    %cst_98 = arith.constant dense<0.000000e+00> : vector<8xf32>
    %260 = vector.multi_reduction <add>, %257, %cst_98 [1] : vector<8x32xf32> to vector<8xf32>
    %261 = vector.shape_cast %260 : vector<8xf32> to vector<8x1xf32>
    %cst_99 = arith.constant 3.200000e+01 : f32
    %262 = vector.broadcast %cst_99 : f32 to vector<8x1xf32>
    %263 = arith.divf %261, %262 : vector<8x1xf32>
    %264 = vector.broadcast %263 : vector<8x1xf32> to vector<8x32xf32>
    %265 = arith.subf %257, %264 : vector<8x32xf32>
    %266 = arith.mulf %265, %265 : vector<8x32xf32>
    %cst_100 = arith.constant dense<0.000000e+00> : vector<8xf32>
    %267 = vector.multi_reduction <add>, %266, %cst_100 [1] : vector<8x32xf32> to vector<8xf32>
    %268 = vector.shape_cast %267 : vector<8xf32> to vector<8x1xf32>
    %cst_101 = arith.constant 3.200000e+01 : f32
    %269 = vector.broadcast %cst_101 : f32 to vector<8x1xf32>
    %270 = arith.divf %268, %269 : vector<8x1xf32>
    %271 = vector.broadcast %263 : vector<8x1xf32> to vector<8x32xf32>
    %272 = arith.subf %257, %271 : vector<8x32xf32>
    %cst_102 = arith.constant 9.99999996E-13 : f32
    %273 = vector.broadcast %cst_102 : f32 to vector<8x1xf32>
    %274 = arith.addf %270, %273 : vector<8x1xf32>
    %275 = math.rsqrt %274 : vector<8x1xf32>
    %276 = vector.broadcast %275 : vector<8x1xf32> to vector<8x32xf32>
    %277 = arith.mulf %272, %276 : vector<8x32xf32>
    %278 = vector.broadcast %258 : vector<1x32xf32> to vector<8x32xf32>
    %279 = arith.mulf %277, %278 : vector<8x32xf32>
    %280 = vector.broadcast %259 : vector<1x32xf32> to vector<8x32xf32>
    %281 = arith.addf %279, %280 : vector<8x32xf32>
    %c0_103 = arith.constant 0 : index
    %c0_104 = arith.constant 0 : index
    %c0_105 = arith.constant 0 : index
    %282 = vector.load %arg22[%c0_103, %c0_104, %c0_105] : memref<1x8x32xf32, #tpu.memory_space<vmem>>, vector<1x8x32xf32>
    %283 = vector.shape_cast %282 : vector<1x8x32xf32> to vector<8x32xf32>
    %284 = vector.shape_cast %281 : vector<8x32xf32> to vector<1x8x32xf32>
    tpu.vector_store %arg22[%c0_103, %c0_104, %c0_105], %284 {strides = array<i32>} : memref<1x8x32xf32, #tpu.memory_space<vmem>>, vector<1x8x32xf32>,
    return
  }
  func.func @transform_0(%arg0: i32) -> (i32, i32, i32) {
    %c0_i32 = arith.constant 0 : i32
    %c0_i32_0 = arith.constant 0 : i32
    %c0_i32_1 = arith.constant 0 : i32
    return %arg0, %c0_i32, %c0_i32_0 : i32, i32, i32
  }
  func.func @transform_1(%arg0: i32) -> (i32, i32, i32) {
    %c0_i32 = arith.constant 0 : i32
    %c0_i32_0 = arith.constant 0 : i32
    %c0_i32_1 = arith.constant 0 : i32
    return %arg0, %c0_i32, %c0_i32_0 : i32, i32, i32
  }
  func.func @transform_2(%arg0: i32) -> (i32, i32, i32) {
    %c0_i32 = arith.constant 0 : i32
    %c0_i32_0 = arith.constant 0 : i32
    %c0_i32_1 = arith.constant 0 : i32
    return %arg0, %c0_i32, %c0_i32_0 : i32, i32, i32
  }
  func.func @transform_3(%arg0: i32) -> (i32, i32, i32) {
    %c0_i32 = arith.constant 0 : i32
    %c0_i32_0 = arith.constant 0 : i32
    %c0_i32_1 = arith.constant 0 : i32
    return %arg0, %c0_i32, %c0_i32_0 : i32, i32, i32
  }
  func.func @transform_4(%arg0: i32) -> (i32, i32) {
    %c0_i32 = arith.constant 0 : i32
    %c0_i32_0 = arith.constant 0 : i32
    %c0_i32_1 = arith.constant 0 : i32
    return %c0_i32, %c0_i32_0 : i32, i32
  }
  func.func @transform_5(%arg0: i32) -> (i32, i32) {
    %c0_i32 = arith.constant 0 : i32
    %c0_i32_0 = arith.constant 0 : i32
    %c0_i32_1 = arith.constant 0 : i32
    return %c0_i32, %c0_i32_0 : i32, i32
  }
  func.func @transform_6(%arg0: i32) -> (i32, i32) {
    %c0_i32 = arith.constant 0 : i32
    %c0_i32_0 = arith.constant 0 : i32
    %c0_i32_1 = arith.constant 0 : i32
    return %c0_i32, %c0_i32_0 : i32, i32
  }
  func.func @transform_7(%arg0: i32) -> (i32, i32) {
    %c0_i32 = arith.constant 0 : i32
    %c0_i32_0 = arith.constant 0 : i32
    %c0_i32_1 = arith.constant 0 : i32
    return %c0_i32, %c0_i32_0 : i32, i32
  }
  func.func @transform_8(%arg0: i32) -> (i32, i32) {
    %c0_i32 = arith.constant 0 : i32
    %c0_i32_0 = arith.constant 0 : i32
    %c0_i32_1 = arith.constant 0 : i32
    return %c0_i32, %c0_i32_0 : i32, i32
  }
  func.func @transform_9(%arg0: i32) -> (i32, i32) {
    %c0_i32 = arith.constant 0 : i32
    %c0_i32_0 = arith.constant 0 : i32
    %c0_i32_1 = arith.constant 0 : i32
    return %c0_i32, %c0_i32_0 : i32, i32
  }
  func.func @transform_10(%arg0: i32) -> (i32, i32) {
    %c0_i32 = arith.constant 0 : i32
    %c0_i32_0 = arith.constant 0 : i32
    %c0_i32_1 = arith.constant 0 : i32
    return %c0_i32, %c0_i32_0 : i32, i32
  }
  func.func @transform_11(%arg0: i32) -> (i32, i32) {
    %c0_i32 = arith.constant 0 : i32
    %c0_i32_0 = arith.constant 0 : i32
    %c0_i32_1 = arith.constant 0 : i32
    return %c0_i32, %c0_i32_0 : i32, i32
  }
  func.func @transform_12(%arg0: i32) -> (i32, i32, i32) {
    %c0_i32 = arith.constant 0 : i32
    %c0_i32_0 = arith.constant 0 : i32
    %c0_i32_1 = arith.constant 0 : i32
    %c0_i32_2 = arith.constant 0 : i32
    return %c0_i32, %c0_i32_0, %c0_i32_1 : i32, i32, i32
  }
  func.func @transform_13(%arg0: i32) -> (i32, i32) {
    %c0_i32 = arith.constant 0 : i32
    %c0_i32_0 = arith.constant 0 : i32
    %c0_i32_1 = arith.constant 0 : i32
    return %c0_i32, %c0_i32_0 : i32, i32
  }
  func.func @transform_14(%arg0: i32) -> (i32, i32) {
    %c0_i32 = arith.constant 0 : i32
    %c0_i32_0 = arith.constant 0 : i32
    %c0_i32_1 = arith.constant 0 : i32
    return %c0_i32, %c0_i32_0 : i32, i32
  }
  func.func @transform_15(%arg0: i32) -> (i32, i32) {
    %c0_i32 = arith.constant 0 : i32
    %c0_i32_0 = arith.constant 0 : i32
    %c0_i32_1 = arith.constant 0 : i32
    return %c0_i32, %c0_i32_0 : i32, i32
  }
  func.func @transform_16(%arg0: i32) -> (i32, i32) {
    %c0_i32 = arith.constant 0 : i32
    %c0_i32_0 = arith.constant 0 : i32
    %c0_i32_1 = arith.constant 0 : i32
    return %c0_i32, %c0_i32_0 : i32, i32
  }
  func.func @transform_17(%arg0: i32) -> (i32, i32) {
    %c0_i32 = arith.constant 0 : i32
    %c0_i32_0 = arith.constant 0 : i32
    %c0_i32_1 = arith.constant 0 : i32
    return %c0_i32, %c0_i32_0 : i32, i32
  }
  func.func @transform_18(%arg0: i32) -> (i32, i32) {
    %c0_i32 = arith.constant 0 : i32
    %c0_i32_0 = arith.constant 0 : i32
    %c0_i32_1 = arith.constant 0 : i32
    return %c0_i32, %c0_i32_0 : i32, i32
  }
  func.func @transform_19(%arg0: i32) -> (i32, i32) {
    %c0_i32 = arith.constant 0 : i32
    %c0_i32_0 = arith.constant 0 : i32
    %c0_i32_1 = arith.constant 0 : i32
    return %c0_i32, %c0_i32_0 : i32, i32
  }
  func.func @transform_20(%arg0: i32) -> (i32, i32) {
    %c0_i32 = arith.constant 0 : i32
    %c0_i32_0 = arith.constant 0 : i32
    %c0_i32_1 = arith.constant 0 : i32
    return %c0_i32, %c0_i32_0 : i32, i32
  }
  func.func @transform_21(%arg0: i32) -> (i32, i32, i32) {
    %c0_i32 = arith.constant 0 : i32
    %c0_i32_0 = arith.constant 0 : i32
    %c0_i32_1 = arith.constant 0 : i32
    return %arg0, %c0_i32, %c0_i32_0 : i32, i32, i32
  }
}

module attributes {stable_mosaic.version = 11 : i64} {
  func.func @_head_kernel(%arg0: i32, %arg1: memref<2x32xf32, #tpu.memory_space<vmem>>, %arg2: memref<32x32xbf16, #tpu.memory_space<vmem>>, %arg3: memref<1x32xf32, #tpu.memory_space<vmem>>, %arg4: memref<32x3xbf16, #tpu.memory_space<vmem>>, %arg5: memref<1x3xf32, #tpu.memory_space<vmem>>, %arg6: memref<2x3xf32, #tpu.memory_space<vmem>>) attributes {dimension_semantics = [#tpu.dimension_semantics<arbitrary>], iteration_bounds = array<i64: 1>, scalar_prefetch = 0 : i64, scratch_operands = 0 : i64, tpu.core_type = #tpu.core_type<tc>, window_params = [{pipeline_mode = #tpu.pipeline_mode<synchronous>, transform_indices = @transform_0, window_bounds = array<i64: 2, 32>}, {pipeline_mode = #tpu.pipeline_mode<synchronous>, transform_indices = @transform_1, window_bounds = array<i64: 32, 32>}, {pipeline_mode = #tpu.pipeline_mode<synchronous>, transform_indices = @transform_2, window_bounds = array<i64: 1, 32>}, {pipeline_mode = #tpu.pipeline_mode<synchronous>, transform_indices = @transform_3, window_bounds = array<i64: 32, 3>}, {pipeline_mode = #tpu.pipeline_mode<synchronous>, transform_indices = @transform_4, window_bounds = array<i64: 1, 3>}, {pipeline_mode = #tpu.pipeline_mode<synchronous>, transform_indices = @transform_5, window_bounds = array<i64: 2, 3>}]} {
    %c0 = arith.constant 0 : index
    %c0_0 = arith.constant 0 : index
    %0 = vector.load %arg1[%c0, %c0_0] : memref<2x32xf32, #tpu.memory_space<vmem>>, vector<2x32xf32>
    %c0_1 = arith.constant 0 : index
    %c0_2 = arith.constant 0 : index
    %1 = vector.load %arg2[%c0_1, %c0_2] : memref<32x32xbf16, #tpu.memory_space<vmem>>, vector<32x32xbf16>
    %2 = arith.truncf %0 : vector<2x32xf32> to vector<2x32xbf16>
    %cst = arith.constant dense<0.000000e+00> : vector<2x32xf32>
    %3 = tpu.matmul %2, %1, %cst {dimension_numbers = #tpu.dot_dimension_numbers<[1], [0], [0], [1], [0, 0, 1, 1], [], []>} : vector<2x32xbf16>, vector<32x32xbf16>, vector<2x32xf32> -> vector<2x32xf32>
    %c0_3 = arith.constant 0 : index
    %c0_4 = arith.constant 0 : index
    %4 = vector.load %arg3[%c0_3, %c0_4] : memref<1x32xf32, #tpu.memory_space<vmem>>, vector<1x32xf32>
    %5 = vector.broadcast %4 : vector<1x32xf32> to vector<2x32xf32>
    %6 = arith.addf %3, %5 : vector<2x32xf32>
    %7 = math.tanh %6 : vector<2x32xf32>
    %c0_5 = arith.constant 0 : index
    %c0_6 = arith.constant 0 : index
    %8 = vector.load %arg4[%c0_5, %c0_6] : memref<32x3xbf16, #tpu.memory_space<vmem>>, vector<32x3xbf16>
    %9 = arith.truncf %7 : vector<2x32xf32> to vector<2x32xbf16>
    %cst_7 = arith.constant dense<0.000000e+00> : vector<2x3xf32>
    %10 = tpu.matmul %9, %8, %cst_7 {dimension_numbers = #tpu.dot_dimension_numbers<[1], [0], [0], [1], [0, 0, 1, 1], [], []>} : vector<2x32xbf16>, vector<32x3xbf16>, vector<2x3xf32> -> vector<2x3xf32>
    %c0_8 = arith.constant 0 : index
    %c0_9 = arith.constant 0 : index
    %11 = vector.load %arg5[%c0_8, %c0_9] : memref<1x3xf32, #tpu.memory_space<vmem>>, vector<1x3xf32>
    %12 = vector.broadcast %11 : vector<1x3xf32> to vector<2x3xf32>
    %13 = arith.addf %10, %12 : vector<2x3xf32>
    %c0_10 = arith.constant 0 : index
    %c0_11 = arith.constant 0 : index
    %14 = vector.load %arg6[%c0_10, %c0_11] : memref<2x3xf32, #tpu.memory_space<vmem>>, vector<2x3xf32>
    tpu.vector_store %arg6[%c0_10, %c0_11], %13 {strides = array<i32>} : memref<2x3xf32, #tpu.memory_space<vmem>>, vector<2x3xf32>,
    return
  }
  func.func @transform_0(%arg0: i32) -> (i32, i32) {
    %c0_i32 = arith.constant 0 : i32
    %c0_i32_0 = arith.constant 0 : i32
    %c0_i32_1 = arith.constant 0 : i32
    return %c0_i32, %c0_i32_0 : i32, i32
  }
  func.func @transform_1(%arg0: i32) -> (i32, i32) {
    %c0_i32 = arith.constant 0 : i32
    %c0_i32_0 = arith.constant 0 : i32
    %c0_i32_1 = arith.constant 0 : i32
    return %c0_i32, %c0_i32_0 : i32, i32
  }
  func.func @transform_2(%arg0: i32) -> (i32, i32) {
    %c0_i32 = arith.constant 0 : i32
    %c0_i32_0 = arith.constant 0 : i32
    %c0_i32_1 = arith.constant 0 : i32
    return %c0_i32, %c0_i32_0 : i32, i32
  }
  func.func @transform_3(%arg0: i32) -> (i32, i32) {
    %c0_i32 = arith.constant 0 : i32
    %c0_i32_0 = arith.constant 0 : i32
    %c0_i32_1 = arith.constant 0 : i32
    return %c0_i32, %c0_i32_0 : i32, i32
  }
  func.func @transform_4(%arg0: i32) -> (i32, i32) {
    %c0_i32 = arith.constant 0 : i32
    %c0_i32_0 = arith.constant 0 : i32
    %c0_i32_1 = arith.constant 0 : i32
    return %c0_i32, %c0_i32_0 : i32, i32
  }
  func.func @transform_5(%arg0: i32) -> (i32, i32) {
    %c0_i32 = arith.constant 0 : i32
    %c0_i32_0 = arith.constant 0 : i32
    %c0_i32_1 = arith.constant 0 : i32
    return %c0_i32, %c0_i32_0 : i32, i32
  }
}

</mosaic_0001>

<bundles_post_ra>
// kernel: _lambda_.4
= control target key start
LH: loop header
LB: loop body
LE: loop exit
PB: predicated region body
PF: predicated region fallthrough
CT: control target
= control target key end

     0   :  { %s336_s9 = smov 0   ;;  %s356_s0 = inlined_call_operand.vmem [shape: bf16[16,32], index: 0, kind: input, shape index: {}]   ;;  %s357_s1 = inlined_call_operand.vmem [shape: bf16[2,32,32], index: 1, kind: input, shape index: {}]   ;;  %s358_s2 = inlined_call_operand.vmem [shape: f32[2,16,32], index: 2, kind: output, shape index: {}]  }
   0x1 LB: > { %s270_s10 = sadd.s32 4294967295, %s317_s9   ;;  %p274_p0 = scmp.ge.s32.totalorder %s317_s9, 1  ;;  %s317_s9 = sphi %s336_s9, %s12_s9  }
   0x2   : > { %p112_p1 = scmp.lt.s32.totalorder %s317_s9, 3 }
   0x4   : > { %p113_p2 = pnand %p274_p0, %p112_p1 }
   0x5   : > { %p134_p3 = scmp.lt.s32.totalorder (!%p113_p2), %s270_s10, 1 }
   0x6   : > { %116 = sbr.rel (%p113_p2) target bundleno = 221 (0xdd), region = 28 }
   0xb   : > { %v319_v0 = vmov 0.0   ;;  %vm320_vm0 = vmmov 0   ;;  %s360_s10 = smov (!%p134_p3, %s270_s10), 1  ;;  %v310_v3 = vld [vmem:[%s356_s0] sm:$0xff]   ;;  %vm168_vm1 = vcmask 261120  }
   0xc   : > { %290 = vmatprep.subr.bf16.mxu0 %v319_v0  ;;  %294 = vmatprep.mubr.msk.bf16.mxu0 %vm320_vm0, %v319_v0  ;;  %s285_s11 = sshll.u32 %s360_s10, 4 }
   0xd   : > { %s138_s14 = scalar_lea.vmem %s357_s1, %s285_s11  ;;  %s143_s19 = scalar_lea.vmem %s358_s2, %s285_s11 }
   0xe   : > { %v308_v1 = vld [vmem:[%s138_s14 + $0x8] sm:$0xff]   ;;  %v309_v2 = vld [vmem:[%s138_s14] sm:$0xff]  }
   0xf   : > { %291 = vmatpush3.bf16.msra.mxu0 %v308_v1 }
  0x10   : > { %292 = vmatprep.subr.bf16.mxu0 %v319_v0 }
  0x13   : > { %293 = vmatpush3.bf16.msra.mxu0 %v309_v2 }
  0x16   : > { %295 = vmatmul.mubr.msk.bf16.vlgmr.msra.gmra.mxu0 %vm168_vm1, %v310_v3 }
  0xd6   : > { %v206_v4 = vpop.f32.mrf.mxu0 }
  0xd7   : > { %213 = vst.msk [vmem:[%s143_s19] sm:$0xff] %vm168_vm1, %v206_v4 }
  0xd8   : > { %v296_v5 = vpop.f32.mrf.mxu0 }
  0xda   : > { %v209_v6 = vpop.f32.mrf.mxu0 }
  0xdb   : > { %214 = vst.msk [vmem:[%s143_s19 + $0x8] sm:$0xff] %vm168_vm1, %v209_v6 }
  0xdc   : > { %v297_v7 = vpop.f32.mrf.mxu0 }
  0xdd PF: > { %s12_s9 = sadd.s32 1, %s317_s9  }
  0xde   : > { %p9_p4 = scmp.ge.s32.totalorder %s12_s9, 4  }
  0xe0   :  { %11 = sbr.rel (!%p9_p4) target bundleno = 1 (0x1), region = 58 }

// kernel: _lambda_.7
= control target key start
LH: loop header
LB: loop body
LE: loop exit
PB: predicated region body
PF: predicated region fallthrough
CT: control target
= control target key end

     0   :  { %v236_v1 = vmov 0.0   ;;  %vm237_vm0 = vmmov 0   ;;  %s295_s0 = inlined_call_operand.vmem [shape: f32[2,32], index: 0, kind: input, shape index: {}]   ;;  %s296_s1 = inlined_call_operand.vmem [shape: bf16[32,32], index: 1, kind: input, shape index: {}]   ;;  %s297_s2 = inlined_call_operand.vmem [shape: f32[1,32], index: 2, kind: input, shape index: {}]   ;;  %s298_s3 = inlined_call_operand.vmem [shape: bf16[32,3], index: 3, kind: input, shape index: {}]   ;;  %s299_s4 = inlined_call_operand.vmem [shape: f32[1,3], index: 4, kind: input, shape index: {}]   ;;  %s300_s5 = inlined_call_operand.hbm [shape: f32[2,3], index: 5, kind: output, shape index: {}]  }
   0x1   :  { %v208_v0 = vld [vmem:[%s296_s1 + $0x8] sm:$0xff]   ;;  %189 = vmatprep.subr.bf16.mxu0 %v236_v1  ;;  %197 = vmatprep.subr.bf16.mxu1 %v236_v1  ;;  %v209_v2 = vld [vmem:[%s296_s1] sm:$0xff]  }
   0x2   :  { %190 = vmatpush3.bf16.msra.mxu0 %v208_v0  ;;  %193 = vmatprep.mubr.msk.bf16.mxu0 %vm237_vm0, %v236_v1  ;;  %v22_v3 = vld [vmem:[%s295_s0] sm:$0x3] }
   0x3   :  { %191 = vmatprep.subr.bf16.mxu0 %v236_v1  ;;  %201 = vmatprep.mubr.msk.bf16.mxu1 %vm237_vm0, %v236_v1 }
   0x4   :  { %10 = vsyncpa [#allocation3], 0  ;;  %v27_v4 = vpack.c.bf16 %v22_v3, %v22_v3  ;;  %vm47_vm1 = vcmask 261120   ;;  %v210_v5 = vld [vmem:[%s298_s3 + $0x8] sm:$0xff]   ;;  %v211_v6 = vld [vmem:[%s298_s3] sm:$0xff]   ;;  %s238_s3 = smov [#allocation2]  }
   0x5   :  { %198 = vmatpush3.bf16.msra.mxu1 %v210_v5  ;;  %v175_v7 = vld [vmem:[%s297_s2] ss:$0 sm:$0xff]  ;;  %s167_s30 = sshll.u32 %s238_s3, 4  ;;  %vm159_vm2 = vcmask 17408   ;;  %s168_s30 = int_to_ptr.vmem [resolvable:$true] %s167_s30 }
   0x6   :  { %192 = vmatpush3.bf16.msra.mxu0 %v209_v2  ;;  %199 = vmatprep.subr.bf16.mxu1 %v236_v1  ;;  %v179_v15 = vld [vmem:[%s299_s4] ss:$0 sm:$0xff]  ;;  %s214_s2 = scalar_lea.vmem %s168_s30, 32  ;;  %p219_p1 = scmp.lt.s32.totalorder %s168_s30, %s168_s30 }
   0x7   :  { %p215_p0 = scmp.ne.s32.totalorder %s168_s30, %s214_s2  ;;  %p220_p2 = scmp.lt.s32.totalorder %s214_s2, %s214_s2 }
   0x9   :  { %194 = vmatmul.mubr.msk.bf16.vlgmr.msra.gmra.mxu0 %vm47_vm1, %v27_v4  ;;  %200 = vmatpush3.bf16.msra.mxu1 %v211_v6  ;;  %p221_p3 = por %p220_p2, %p219_p1 }
   0xb   :  { %p222_p4 = pnand %p221_p3, %p215_p0 }
  0xc9   :  { %v85_v8 = vpop.f32.mrf.mxu0 }
  0xca   :  { %v86_v9 = vadd.f32 %v175_v7, %v85_v8 }
  0xcb   :  { %v195_v10 = vpop.f32.mrf.mxu0 }
  0xcc   :  { %212 = vtanh.f32 %v86_v9 }
  0xcd   :  { %v88_v11 = vpop.f32.mrf.mxu0 }
  0xcf   :  { %v196_v12 = vpop.f32.mrf.mxu0 }
  0xd9   :  { %v213_v13 = vpop.eup %212 }
  0xda   :  { %v96_v14 = vpack.c.bf16 %v213_v13, %v213_v13 }
  0xdc   :  { %202 = vmatmul.mubr.msk.bf16.vlgmr.msra.gmra.mxu1 %vm47_vm1, %v96_v14 }
 0x19c   :  { %v153_v16 = vpop.f32.mrf.mxu1 }
 0x19d   :  { %v154_v17 = vadd.f32 %v179_v15, %v153_v16 }
 0x19e   :  { %v203_v18 = vpop.f32.mrf.mxu1 }
 0x19f   :  { %160 = vst.msk [vmem:[#allocation2] sm:$0x3] %vm159_vm2, %v154_v17 }
 0x1a0   :  { %v156_v19 = vpop.f32.mrf.mxu1 }
 0x1a1   :  { %225 = shalt.err (!%p222_p4)
}
 0x1a2   :  { %170 = dma.vmem_to_hbm [thread:$0]  %s168_s30, 32, %s300_s5, [#allocation3]   ;;  %v204_v20 = vpop.f32.mrf.mxu1 }
 0x1a3   :  { %234 = dma.done.wait [#allocation3], 32  }
 0x1a4   :  { %235 = vsyncadd [#allocation3], 4294967264 }
 0x1a5   :  { %174 = vsyncpa [#allocation3], 1 }

// kernel: _lambda_.5
= control target key start
LH: loop header
LB: loop body
LE: loop exit
PB: predicated region body
PF: predicated region fallthrough
CT: control target
= control target key end

     0   :  { %s3433_s0 = inlined_call_operand.vmem [shape: f32[2,8,32], index: 0, kind: input, shape index: {}]   ;;  %s3434_s1 = inlined_call_operand.vmem [shape: f32[2,1,8], index: 1, kind: input, shape index: {}]   ;;  %s3435_s2 = inlined_call_operand.vmem [shape: f32[2,1,8], index: 2, kind: input, shape index: {}]   ;;  %s3436_s3 = inlined_call_operand.vmem [shape: f32[2,8,1], index: 3, kind: input, shape index: {}]   ;;  %s3437_s4 = inlined_call_operand.vmem [shape: f32[16,32], index: 4, kind: input, shape index: {}]   ;;  %s3438_s5 = inlined_call_operand.vmem [shape: bf16[32,32], index: 5, kind: input, shape index: {}]   ;;  %s3439_s6 = inlined_call_operand.vmem [shape: bf16[32,32], index: 6, kind: input, shape index: {}]   ;;  %s3440_s7 = inlined_call_operand.vmem [shape: bf16[32,32], index: 7, kind: input, shape index: {}]   ;;  %s3441_s8 = inlined_call_operand.vmem [shape: bf16[32,32], index: 8, kind: input, shape index: {}]   ;;  %s3442_s9 = inlined_call_operand.vmem [shape: f32[2,16], index: 9, kind: input, shape index: {}]   ;;  %s3443_s10 = inlined_call_operand.vmem [shape: f32[2,16], index: 10, kind: input, shape index: {}]   ;;  %s3444_s11 = inlined_call_operand.vmem [shape: f32[2,16], index: 11, kind: input, shape index: {}]   ;;  %s3445_s12 = inlined_call_operand.vmem [shape: f32[2,2,16], index: 12, kind: input, shape index: {}]   ;;  %s3446_s13 = inlined_call_operand.vmem [shape: f32[1,32], index: 13, kind: input, shape index: {}, may-alias: {13,19}]   ;;  %s3447_s14 = inlined_call_operand.vmem [shape: f32[1,32], index: 14, kind: input, shape index: {}, may-alias: {14,18,20}]   ;;  %s3448_s15 = inlined_call_operand.vmem [shape: bf16[32,64], index: 15, kind: input, shape index: {}]   ;;  %s3449_s16 = inlined_call_operand.vmem [shape: f32[1,64], index: 16, kind: input, shape index: {}]   ;;  %s3450_s17 = inlined_call_operand.vmem [shape: bf16[64,32], index: 17, kind: input, shape index: {}]   ;;  %s3451_s18 = inlined_call_operand.vmem [shape: f32[1,32], index: 18, kind: input, shape index: {}, may-alias: {14,18,20}]   ;;  %s3452_s19 = inlined_call_operand.vmem [shape: f32[1,32], index: 19, kind: input, shape index: {}, may-alias: {13,19}]   ;;  %s3453_s20 = inlined_call_operand.vmem [shape: f32[1,32], index: 20, kind: input, shape index: {}, may-alias: {14,18,20}]   ;;  %s3454_s21 = inlined_call_operand.vmem [shape: f32[2,8,32], index: 21, kind: output, shape index: {}]  }
   0x1   :  { %3457 = sst [smem:[#allocation2_spill]] %s3433_s0 }
   0x2   :  { %3458 = sst [smem:[#allocation3_spill]] %s3434_s1 }
   0x3   :  { %3459 = sst [smem:[#allocation4_spill]] %s3435_s2  ;;  %s3031_s2 = smov 0  }
   0x4   :  { %3460 = sst [smem:[#allocation5_spill]] %s3436_s3 }
   0x5   :  { %3461 = sst [smem:[#allocation6_spill]] %s3437_s4 }
   0x6   :  { %3462 = sst [smem:[#allocation7_spill]] %s3438_s5 }
   0x7 LB: > { %s2547_s25 = sadd.s32 4294967295, %s2913_s2   ;;  %p2551_p0 = scmp.ge.s32.totalorder %s2913_s2, 1  ;;  %s2913_s2 = sphi %s3031_s2, %s31_s2  }
   0x8   : > { %p611_p1 = scmp.lt.s32.totalorder %s2913_s2, 3 }
   0xa   : > { %p612_p2 = pnand %p2551_p0, %p611_p1 }
   0xb   : > { %s3463_s3 = sld [smem:[#allocation7_spill]] (!%p612_p2)  ;;  %p679_p3 = scmp.lt.s32.totalorder (!%p612_p2), %s2547_s25, 1 }
   0xc   : > { %615 = sbr.rel (%p612_p2) target bundleno = 2993 (0xbb1), region = 104  ;;  %s3464_s27 = sld [smem:[#allocation6_spill]] (!%p612_p2) }
   0xd   : > { %s3465_s0 = sld [smem:[#allocation2_spill]] (!%p612_p2)  ;;  %s2920_s5 = smov (!%p612_p2), 112  }
   0xe   : > { %s3466_s24 = sld [smem:[#allocation5_spill]] (!%p612_p2) }
  0x11   : > { %v2879_v0 = vld [vmem:[%s3463_s3 + $0x8] sm:$0xff]   ;;  %v2915_v1 = vmov 0.0   ;;  %v2880_v2 = vld [vmem:[%s3463_s3] sm:$0xff]   ;;  %vm2916_vm0 = vmmov 0   ;;  %s3470_s25 = smov (!%p679_p3, %s2547_s25), 1  ;;  %vm922_vm1 = vcmask 130048  }
  0x12   : > { %2677 = vmatprep.subr.bf16.mxu0 %v2915_v1  ;;  %2685 = vmatprep.subr.bf16.mxu1 %v2915_v1  ;;  %v2881_v3 = vld [vmem:[%s3439_s6 + $0x8] sm:$0xff]   ;;  %v2882_v4 = vld [vmem:[%s3439_s6] sm:$0xff]   ;;  %s3061_s22 = sshll.u32 %s3470_s25, 3  ;;  %vm745_vm2 = vcmask 261120   ;;  %vm1348_vm3 = vcmask 1043456   ;;  %vm1342_vm4 = vcmask 1040384  }
  0x13   : > { %2678 = vmatpush3.bf16.msra.mxu0 %v2879_v0  ;;  %2681 = vmatprep.mubr.msk.bf16.mxu0 %vm2916_vm0, %v2915_v1  ;;  %v2883_v5 = vld [vmem:[%s3440_s7 + $0x8] sm:$0xff]   ;;  %s682_s4 = scalar_lea.vmem %s3465_s0, %s3061_s22  ;;  %v2884_v11 = vld [vmem:[%s3440_s7] sm:$0xff]   ;;  %vm1344_vm5 = vcmask 1041408   ;;  %vm1346_vm6 = vcmask 1042432   ;;  %vm1350_vm7 = vcmask 1044480   ;;  %vm1352_vm8 = vcmask 1045504   ;;  %s696_s23 = scalar_lea.vmem %s3454_s21, %s3061_s22 }
  0x14   : > { %2679 = vmatprep.subr.bf16.mxu0 %v2915_v1  ;;  %2689 = vmatprep.mubr.msk.bf16.mxu1 %vm2916_vm0, %v2915_v1  ;;  %v903_v6 = vld [vmem:[%s3464_s27 + $0x8] sm:$0xff]  ;;  %v3077_v8 = vld [vmem:[%s682_s4] sm:$0xff]  ;;  %s692_s26 = scalar_lea.vmem %s3466_s24, %s3061_s22  ;;  %vm1354_vm9 = vcmask 1046528   ;;  %s2919_s0 = smov 16   ;;  %vm1467_vm15 = vcmask 64512  }
  0x15   : > { %2686 = vmatpush3.bf16.msra.mxu1 %v2881_v3  ;;  %v3075_v7 = vpack.c.bf16 %v903_v6, %v903_v6  ;;  %v732_v9 = vpack.c.bf16 %v3077_v8, %v3077_v8  ;;  %v902_v12 = vld [vmem:[%s3464_s27] sm:$0xff]  ;;  %s3467_s24 = sld [smem:[#allocation3_spill]] }
  0x16   : > { %2687 = vmatprep.subr.bf16.mxu1 %v2915_v1  ;;  %v3102_v13 = vpack.c.bf16 %v903_v6, %v902_v12  ;;  %v2566_v29 = vld [vmem:[%s3443_s10] ss:$0 sm:$0xff]  ;;  %v2917_v12 = vmov 0   ;;  %s3468_s4 = sld [smem:[#allocation4_spill]] }
  0x17   : > { %2680 = vmatpush3.bf16.msra.mxu0 %v2880_v2  ;;  %v927_v10 = vsel %vm922_vm1, %v3075_v7, 0  ;;  %v907_v56 = vld [vmem:[%s3445_s12] sm:$0x3]  ;;  %2875 = vset.pattern.permute.xlu0 %v2917_v12 }
  0x18   : > { %2693 = vmatprep.subr.bf16.mxu0 %v2915_v1  ;;  %v973_v14 = vshrl.u32 %v3102_v13, 16  ;;  %v976_v15 = vshll.u32 %v3102_v13, 16  ;;  %v1029_v31 = vrot.slane %v3102_v13, 3  ;;  %v1127_v45 = vrot.slane %v3102_v13, 2  ;;  %v2575_v63 = vld [vmem:[%s3444_s11] ss:$0 sm:$0xff]  ;;  %2877 = vset.pattern.permute.xlu1 %v2917_v12 }
  0x19   : > { %2688 = vmatpush3.bf16.msra.mxu1 %v2882_v4  ;;  %v1225_v53 = vrot.slane %v3102_v13, 1  ;;  %v1362_v59 = vpack.c.bf16 %v907_v56, %v907_v56  ;;  %v2565_v3 = vld [vmem:[%s3442_s9] ss:$0 sm:$0xff] }
  0x1a   : > { %2701 = vmatprep.subr.bf16.mxu1 %v2915_v1  ;;  %2682 = vmatmul.mubr.msk.bf16.vlgmr.msra.gmra.mxu0 %vm745_vm2, %v732_v9  ;;  %v975_v16 = vrot.slane %v973_v14, 3  ;;  %v978_v17 = vrot.slane %v976_v15, 4  ;;  %v1077_v20 = vrot.slane %v973_v14, 2  ;;  %v1078_v21 = vrot.slane %v976_v15, 3 }
  0x1b   : > { %2694 = vmatpush3.bf16.msra.mxu0 %v2883_v5  ;;  %2697 = vmatprep.mubr.msk.bf16.mxu0 %vm2916_vm0, %v2915_v1  ;;  %v1175_v23 = vrot.slane %v973_v14, 1  ;;  %v1176_v24 = vrot.slane %v976_v15, 2  ;;  %v1273_v26 = vrot.slane %v976_v15, 1  ;;  %v1034_v38 = vsel %vm922_vm1, %v1029_v31, 0 }
  0x1c   : > { %2690 = vmatmul.mubr.msk.bf16.vlgmr.msra.gmra.mxu1 %vm745_vm2, %v732_v9  ;;  %2695 = vmatprep.subr.bf16.mxu0 %v2915_v1  ;;  %v3106_v18 = vor.u32 %v978_v17, %v975_v16  ;;  %v3111_v22 = vor.u32 %v1078_v21, %v1077_v20  ;;  %v1132_v49 = vsel %vm922_vm1, %v1127_v45, 0  ;;  %v1230_v55 = vsel %vm922_vm1, %v1225_v53, 0  ;;  %s688_s30 = scalar_lea.vmem %s3468_s4, %s3470_s25 }
  0x1d   : > { %2702 = vmatpush3.bf16.xpose.msra.mxu1 %v927_v10  ;;  %2703 = vmatprep.mubr.msk.bf16.mxu1 %vm2916_vm0, %v2915_v1  ;;  %v3113_v25 = vor.u32 %v1176_v24, %v1175_v23  ;;  %v3115_v27 = vor.u32 %v1273_v26, %v973_v14  ;;  %v1367_v62 = vsel %vm922_vm1, %v1362_v59, 0  ;;  %v714_v14 = vld [vmem:[%s692_s26] sm:$0xff]  ;;  %v2918_v15 = vmov 1   ;;  %s685_s26 = scalar_lea.vmem %s3467_s24, %s3470_s25 }
  0x1e   : > { %2713 = vmatprep.subr.bf16.mxu1 %v2915_v1  ;;  %v984_v19 = vsel %vm922_vm1, %v3106_v18, 0  ;;  %v1084_v42 = vsel %vm922_vm1, %v3111_v22, 0  ;;  %718 = vperm.xlu0 %2875, %v714_v14  }
  0x1f   : > { %2696 = vmatpush3.bf16.msra.mxu0 %v2884_v11  ;;  %v1182_v52 = vsel %vm922_vm1, %v3113_v25, 0  ;;  %v1279_v58 = vsel %vm922_vm1, %v3115_v27, 0 }
  0x20   : > { %2707 = vmatprep.subr.bf16.mxu0 %v2915_v1 }
  0x22   : > { %2698 = vmatmul.mubr.msk.bf16.vlgmr.msra.gmra.mxu0 %vm745_vm2, %v732_v9  ;;  %2876 = vset.pattern.permute.xlu0 %v2918_v15 }
  0x23   : > { %2709 = vmatprep.mubr.msk.bf16.mxu0 %vm2916_vm0, %v2915_v1  ;;  %2708 = vmatpush3.bf16.xpose.msra.mxu0 %v984_v19 }
  0x24   : > { %2719 = vmatprep.subr.bf16.mxu0 %v2915_v1 }
  0xda   : > { %v783_v28 = vpop.f32.mrf.mxu0 }
  0xdb   : > { %v3120_v30 = vmul.f32 0.25, %v783_v28 }
  0xdc   : > { %v840_v32 = vpop.f32.mrf.mxu1  ;;  %v2683_v33 = vpop.f32.mrf.mxu0 }
  0xdd   : > { %v919_v34 = vadd.f32 %v2566_v29, %v3120_v30  ;;  %v3167_v60 = vpack.c.bf16 %v840_v32, %v840_v32  ;;  %v1360_v4 = vadd.f32 %v2575_v63, %v3120_v30  ;;  %v912_v6 = vadd.f32 %v2565_v3, %v3120_v30 }
  0xde   : > { %v2691_v35 = vpop.f32.mrf.mxu1  ;;  %v786_v36 = vpop.f32.mrf.mxu0 }
  0xdf   : > { %v920_v37 = vpack.c.bf16 %v919_v34, %v919_v34  ;;  %v1423_v0 = vsel %vm922_vm1, %v3167_v60, 0  ;;  %v1361_v9 = vpack.c.bf16 %v1360_v4, %v1360_v4  ;;  %v913_v11 = vpack.c.bf16 %v912_v6, %v912_v6 }
  0xe0   : > { %v843_v39 = vpop.f32.mrf.mxu1  ;;  %v2684_v40 = vpop.f32.mrf.mxu0 }
  0xe1   : > { %2704 = vmatmul.mubr.msk.bf16.vlgmr.msra.gmra.mxu1 %vm922_vm1, %v920_v37  ;;  %v970_v41 = vshrl.u32 %v920_v37, 16  ;;  %v1027_v48 = vrot.slane %v920_v37, 1  ;;  %v1126_v54 = vrot.slane %v920_v37, 2  ;;  %v1224_v61 = vrot.slane %v920_v37, 3 }
  0xe2   : > { %v2692_v43 = vpop.f32.mrf.mxu1  ;;  %2714 = vmatpush3.bf16.xpose.msra.mxu1 %v1034_v38  ;;  %2715 = vmatprep.mubr.msk.bf16.mxu1 %vm2916_vm0, %v2915_v1  ;;  %v896_v44 = vpop.f32.mrf.mxu0 }
  0xe3   : > { %2710 = vmatmul.mubr.msk.bf16.vlgmr.msra.gmra.mxu0 %vm922_vm1, %v970_v41  ;;  %2725 = vmatprep.subr.bf16.mxu1 %v2915_v1  ;;  %v1076_v51 = vrot.slane %v970_v41, 1  ;;  %v1174_v57 = vrot.slane %v970_v41, 2  ;;  %v1272_v2 = vrot.slane %v970_v41, 3  ;;  %v3184_v5 = vpack.c.bf16 %v896_v44, %v896_v44 }
  0xe4   : > { %2720 = vmatpush3.bf16.xpose.msra.mxu0 %v1084_v42  ;;  %2721 = vmatprep.mubr.msk.bf16.mxu0 %vm2916_vm0, %v2915_v1  ;;  %v2699_v46 = vpop.f32.mrf.mxu0 }
  0xe5   : > { %2731 = vmatprep.subr.bf16.mxu0 %v2915_v1  ;;  %v1485_v10 = vsel %vm1348_vm3, %v3184_v5, 0 }
  0xe6   : > { %v899_v47 = vpop.f32.mrf.mxu0 }
  0xe8   : > { %v2700_v50 = vpop.f32.mrf.mxu0 }
  0xe9   : > { %2716 = vmatmul.mubr.msk.bf16.vlgmr.msra.gmra.mxu1 %vm922_vm1, %v1027_v48 }
  0xea   : > { %2726 = vmatpush3.bf16.xpose.msra.mxu1 %v1132_v49  ;;  %2727 = vmatprep.mubr.msk.bf16.mxu1 %vm2916_vm0, %v2915_v1 }
  0xeb   : > { %2722 = vmatmul.mubr.msk.bf16.vlgmr.msra.gmra.mxu0 %vm922_vm1, %v1076_v51  ;;  %2737 = vmatprep.subr.bf16.mxu1 %v2915_v1 }
  0xec   : > { %2732 = vmatpush3.bf16.xpose.msra.mxu0 %v1182_v52  ;;  %2733 = vmatprep.mubr.msk.bf16.mxu0 %vm2916_vm0, %v2915_v1 }
  0xed   : > { %2743 = vmatprep.subr.bf16.mxu0 %v2915_v1 }
  0xf1   : > { %2728 = vmatmul.mubr.msk.bf16.vlgmr.msra.gmra.mxu1 %vm922_vm1, %v1126_v54 }
  0xf2   : > { %2738 = vmatpush3.bf16.xpose.msra.mxu1 %v1230_v55  ;;  %2739 = vmatprep.mubr.msk.bf16.mxu1 %vm2916_vm0, %v2915_v1 }
  0xf3   : > { %2734 = vmatmul.mubr.msk.bf16.vlgmr.msra.gmra.mxu0 %vm922_vm1, %v1174_v57  ;;  %2749 = vmatprep.subr.bf16.mxu1 %v2915_v1 }
  0xf4   : > { %2744 = vmatpush3.bf16.xpose.msra.mxu0 %v1279_v58  ;;  %2745 = vmatprep.mubr.msk.bf16.mxu0 %vm2916_vm0, %v2915_v1 }
  0xf5   : > { %2755 = vmatprep.subr.bf16.mxu0 %v2915_v1 }
  0xf9   : > { %2740 = vmatmul.mubr.msk.bf16.vlgmr.msra.gmra.mxu1 %vm922_vm1, %v1224_v61 }
  0xfa   : > { %2750 = vmatpush3.bf16.xpose.msra.mxu1 %v1367_v62  ;;  %2751 = vmatprep.mubr.msk.bf16.mxu1 %vm2916_vm0, %v2915_v1 }
  0xfb   : > { %2746 = vmatmul.mubr.msk.bf16.vlgmr.msra.gmra.mxu0 %vm922_vm1, %v1272_v2  ;;  %2761 = vmatprep.subr.bf16.mxu1 %v2915_v1 }
  0xfc   : > { %2756 = vmatpush3.bf16.xpose.msra.mxu0 %v1423_v0  ;;  %2757 = vmatprep.mubr.msk.bf16.mxu0 %vm2916_vm0, %v2915_v1 }
  0xfd   : > { %2767 = vmatprep.subr.bf16.mxu0 %v2915_v1 }
 0x101   : > { %2752 = vmatmul.mubr.msk.bf16.vlgmr.msra.gmra.mxu1 %vm922_vm1, %v1361_v9 }
 0x102   : > { %2762 = vmatpush3.bf16.msra.mxu1 %v1485_v10  ;;  %2763 = vmatprep.mubr.msk.bf16.mxu1 %vm2916_vm0, %v2915_v1 }
 0x103   : > { %2758 = vmatmul.mubr.msk.bf16.vlgmr.msra.gmra.mxu0 %vm922_vm1, %v913_v11  ;;  %2773 = vmatprep.subr.bf16.mxu1 %v2915_v1 }
 0x104   : > { %2769 = vmatprep.mubr.msk.bf16.mxu0 %vm2916_vm0, %v2915_v1 }
 0x1a1   : > { %v963_v16 = vpop.f32.mrf.mxu1 }
 0x1a3   : > { %v2705_v17 = vpop.f32.mrf.mxu1  ;;  %v1020_v19 = vpop.f32.mrf.mxu0 }
 0x1a4   : > { %v1322_v20 = vrot.slane %v1020_v19, 7 }
 0x1a5   : > { %v966_v21 = vpop.f32.mrf.mxu1  ;;  %v2711_v23 = vpop.f32.mrf.mxu0 }
 0x1a6   : > { %v1343_v24 = vsel %vm1342_vm4, %v963_v16, %v1322_v20  ;;  %v2581_v16 = vld [vmem:[%s3443_s10 + $0x1] ss:$0 sm:$0xff] }
 0x1a7   : > { %v2706_v26 = vpop.f32.mrf.mxu1  ;;  %v1023_v28 = vpop.f32.mrf.mxu0 }
 0x1a8   : > { %v700_v28 = vlaneseq }
 0x1a9   : > { %v2712_v29 = vpop.f32.mrf.mxu0  ;;  %v1070_v32 = vpop.f32.mrf.mxu1 }
 0x1aa   : > { %v1325_v33 = vrot.slane %v1070_v32, 6  ;;  %v699_v29 = vld [vmem:[%s685_s26] sm:$0x1]  ;;  %v701_v32 = vshrl.u32 %v700_v28, 7 }
 0x1ab   : > { %v2717_v34 = vpop.f32.mrf.mxu1  ;;  %v1120_v35 = vpop.f32.mrf.mxu0  ;;  %vm704_vm10 = vcmp.gt.f32.partialorder %v699_v29, 0.5 }
 0x1ac   : > { %v1345_v36 = vsel %vm1344_vm5, %v1343_v24, %v1325_v33  ;;  %v1328_v37 = vrot.slane %v1120_v35, 5  ;;  %v2590_v24 = vld [vmem:[%s3444_s11 + $0x1] ss:$0 sm:$0xff]  ;;  %v709_v33 = vsub.s32 0, %v701_v32  ;;  %v706_v34 = vsel %vm704_vm10, 1, %v2917_v12 }
 0x1ad   : > { %v1073_v38 = vpop.f32.mrf.mxu1  ;;  %v2723_v39 = vpop.f32.mrf.mxu0  ;;  %v703_v35 = vand.u32 127, %v700_v28 }
 0x1ae   : > { %v1347_v40 = vsel %vm1346_vm6, %v1345_v36, %v1328_v37  ;;  %v710_v36 = vrot.slane %v706_v34, %v709_v33  ;;  %v3232_v37 = vpop.permute.xlu0 %718 }
 0x1af   : > { %v2718_v41 = vpop.f32.mrf.mxu1  ;;  %v1123_v42 = vpop.f32.mrf.mxu0  ;;  %vm705_vm11 = vcmp.ne.s32.totalorder %v701_v32, %v703_v35 }
 0x1b0   : > { %vm711_vm12 = vcmp.eq.s32.totalorder %v710_v36, 1 }
 0x1b1   : > { %v2724_v43 = vpop.f32.mrf.mxu0  ;;  %v1168_v44 = vpop.f32.mrf.mxu1  ;;  %vm712_vm13 = vmand %vm711_vm12, %vm705_vm11 }
 0x1b2   : > { %v1331_v46 = vrot.slane %v1168_v44, 4  ;;  %v3242_v41 = vsel %vm712_vm13, -1e+30, %v2915_v1 }
 0x1b3   : > { %v2729_v47 = vpop.f32.mrf.mxu1  ;;  %v1218_v48 = vpop.f32.mrf.mxu0 }
 0x1b4   : > { %v1349_v49 = vsel %vm1348_vm3, %v1347_v40, %v1331_v46  ;;  %v1334_v50 = vrot.slane %v1218_v48, 3 }
 0x1b5   : > { %v1171_v51 = vpop.f32.mrf.mxu1  ;;  %v2735_v52 = vpop.f32.mrf.mxu0 }
 0x1b6   : > { %v1351_v54 = vsel %vm1350_vm7, %v1349_v49, %v1334_v50 }
 0x1b7   : > { %v2730_v55 = vpop.f32.mrf.mxu1  ;;  %v1221_v56 = vpop.f32.mrf.mxu0 }
 0x1b8   : > { %v2580_v55 = vld [vmem:[%s3442_s9 + $0x1] ss:$0 sm:$0xff] }
 0x1b9   : > { %v2736_v57 = vpop.f32.mrf.mxu0  ;;  %v1266_v58 = vpop.f32.mrf.mxu1 }
 0x1ba   : > { %v1337_v59 = vrot.slane %v1266_v58, 2 }
 0x1bb   : > { %v2741_v61 = vpop.f32.mrf.mxu1  ;;  %v1315_v62 = vpop.f32.mrf.mxu0 }
 0x1bc   : > { %v1340_v63 = vrot.slane %v1315_v62, 1  ;;  %v1353_v0 = vsel %vm1352_vm8, %v1351_v54, %v1337_v59 }
 0x1bd   : > { %v1269_v2 = vpop.f32.mrf.mxu1  ;;  %v2747_v3 = vpop.f32.mrf.mxu0 }
 0x1be   : > { %v1355_v4 = vsel %vm1354_vm9, %v1353_v0, %v1340_v63 }
 0x1bf   : > { %v2742_v6 = vpop.f32.mrf.mxu1  ;;  %v1318_v9 = vpop.f32.mrf.mxu0 }
 0x1c0   : > { %v2579_v6 = vld [vmem:[%s3445_s12 + $0x2] sm:$0x3] }
 0x1c1   : > { %v2748_v10 = vpop.f32.mrf.mxu0  ;;  %v1403_v11 = vpop.f32.mrf.mxu1 }
 0x1c2   : > { %1415 = vperm.xlu1 %2877, %v1403_v11   ;;  %1411 = vperm.xlu0 %2876, %v1403_v11   ;;  %v2001_v10 = vpack.c.bf16 %v2579_v6, %v2579_v6 }
 0x1c3   : > { %v2753_v14 = vpop.f32.mrf.mxu1  ;;  %v1459_v15 = vpop.f32.mrf.mxu0 }
 0x1c4   : > { %v1460_v17 = vadd.f32 %v1459_v15, %v1355_v4  ;;  %v2009_v14 = vsel %vm922_vm1, %v2001_v10, 0 }
 0x1c5   : > { %v1406_v19 = vpop.f32.mrf.mxu1  ;;  %v2759_v20 = vpop.f32.mrf.mxu0 }
 0x1c6   : > { %1547 = vrot.lane.b32.xlu0 %v2581_v16, %s2919_s0 }
 0x1c7   : > { %v2754_v21 = vpop.f32.mrf.mxu1  ;;  %v1462_v23 = vpop.f32.mrf.mxu0 }
 0x1c9   : > { %v2760_v26 = vpop.f32.mrf.mxu0 }
 0x1ca   : > { %1996 = vrot.lane.b32.xlu0 %v2590_v24, %s2919_s0 }
 0x1ce   : > { %1556 = vrot.lane.b32.xlu0 %v3075_v7, %s2920_s5  ;;  %v3234_v7 = vld [vmem:[%s688_s30] ss:$0 sm:$0xff] }
 0x1cf   : > { %vm727_vm14 = vcmp.ne.f32.partialorder %v3232_v37, %v3234_v7 }
 0x23d   : > { %v1416_v38 = vpop.permute.xlu1 %1415  ;;  %v1412_v39 = vpop.permute.xlu0 %1411 }
 0x23e   : > { %v1418_v40 = vsel %vm727_vm14, %v1412_v39, %v1416_v38 }
 0x23f   : > { %v1465_v42 = vadd.f32 %v1460_v17, %v1418_v40 }
 0x241   : > { %v1548_v43 = vpop.permute.xlu0 %1547  ;;  %v1466_v44 = vadd.f32 %v1465_v42, %v3242_v41 }
 0x242   : > { %v1550_v46 = vadd.f32 %v1548_v43, %v3120_v30 }
 0x243   : > { %v1468_v47 = vsel %vm1467_vm15, %v1466_v44, -inf }
 0x244   : > { %v1551_v48 = vpack.c.bf16 %v1550_v46, %v1550_v46  ;;  %1469 = vmax.xlane.f32.xlu1 %v1468_v47 }
 0x245   : > { %v1997_v49 = vpop.permute.xlu0 %1996 }
 0x246   : > { %1553 = vrot.lane.b32.xlu0 %v1551_v48, %s2920_s5  ;;  %v1657_v52 = vrot.slane %v1551_v48, 1  ;;  %v1759_v54 = vrot.slane %v1551_v48, 2  ;;  %v1999_v56 = vadd.f32 %v1997_v49, %v3120_v30  ;;  %v1605_v13 = vshrl.u32 %v1551_v48, 16 }
 0x248   : > { %v2000_v57 = vpack.c.bf16 %v1999_v56, %v1999_v56  ;;  %v1912_v58 = vrot.slane %v1605_v13, 3 }
 0x249   : > { %v1557_v50 = vpop.permute.xlu0 %1556 }
 0x24a   : > { %1660 = vrot.lane.b32.xlu0 %v1029_v31, %s2920_s5  ;;  %v1562_v51 = vsel %vm922_vm1, %v1557_v50, 0  ;;  %v1861_v31 = vrot.slane %v1551_v48, 3 }
 0x24b   : > { %2768 = vmatpush3.bf16.xpose.msra.mxu0 %v1562_v51 }
 0x24c   : > { %2779 = vmatprep.subr.bf16.mxu0 %v2915_v1 }
 0x24e   : > { %1658 = vrot.lane.b32.xlu0 %v1657_v52, %s2920_s5 }
 0x252   : > { %1762 = vrot.lane.b32.xlu0 %v1127_v45, %s2920_s5  ;;  %v1708_v45 = vrot.slane %v1605_v13, 1 }
 0x255   : > { %1864 = vrot.lane.b32.xlu1 %v1225_v53, %s2920_s5  ;;  %v1810_v53 = vrot.slane %v1605_v13, 2 }
 0x256   : > { %1760 = vrot.lane.b32.xlu0 %v1759_v54, %s2920_s5 }
 0x259   : > { %1862 = vrot.lane.b32.xlu1 %v1861_v31, %s2920_s5 }
 0x25d   : > { %1537 = vrot.lane.b32.xlu1 %v2580_v55, %s2919_s0 }
 0x261   : > { %2003 = vrot.lane.b32.xlu1 %v2000_v57, %s2920_s5 }
 0x265   : > { %1609 = vrot.lane.b32.xlu1 %v3106_v18, %s2920_s5 }
 0x269   : > { %1607 = vrot.lane.b32.xlu1 %v1605_v13, %s2920_s5 }
 0x26d   : > { %1709 = vrot.lane.b32.xlu1 %v1708_v45, %s2920_s5 }
 0x271   : > { %1813 = vrot.lane.b32.xlu1 %v3113_v25, %s2920_s5 }
 0x275   : > { %1811 = vrot.lane.b32.xlu1 %v1810_v53, %s2920_s5 }
 0x279   : > { %1915 = vrot.lane.b32.xlu1 %v3115_v27, %s2920_s5 }
 0x27d   : > { %1913 = vrot.lane.b32.xlu1 %v1912_v58, %s2920_s5 }
 0x2b8   : > { %v1554_v59 = vpop.permute.xlu0 %1553 }
 0x2b9   : > { %2770 = vmatmul.mubr.msk.bf16.vlgmr.msra.gmra.mxu0 %vm922_vm1, %v1554_v59 }
 0x2ba   : > { %2781 = vmatprep.mubr.msk.bf16.mxu0 %vm2916_vm0, %v2915_v1 }
 0x2bc   : > { %v1661_v18 = vpop.permute.xlu0 %1660 }
 0x2bd   : > { %v1666_v61 = vsel %vm922_vm1, %v1661_v18, 0 }
 0x2be   : > { %2780 = vmatpush3.bf16.xpose.msra.mxu0 %v1666_v61 }
 0x2bf   : > { %2791 = vmatprep.subr.bf16.mxu0 %v2915_v1 }
 0x2c0   : > { %v1659_v25 = vpop.permute.xlu0 %1658 }
 0x2c4   : > { %v1763_v62 = vpop.permute.xlu0 %1762 }
 0x2c5   : > { %v1768_v63 = vsel %vm922_vm1, %v1763_v62, 0  ;;  %2782 = vmatmul.mubr.msk.bf16.vlgmr.msra.gmra.mxu0 %vm922_vm1, %v1659_v25 }
 0x2c6   : > { %2792 = vmatpush3.bf16.xpose.msra.mxu0 %v1768_v63  ;;  %2793 = vmatprep.mubr.msk.bf16.mxu0 %vm2916_vm0, %v2915_v1 }
 0x2c7   : > { %2803 = vmatprep.subr.bf16.mxu0 %v2915_v1 }
 0x2c8   : > { %v1761_v27 = vpop.permute.xlu0 %1760 }
 0x2cd   : > { %2794 = vmatmul.mubr.msk.bf16.vlgmr.msra.gmra.mxu0 %vm922_vm1, %v1761_v27  ;;  %v1470_v0 = vpop.xlane.xlu1 %1469 }
 0x2ce   : > { %v1471_v2 = vsub.f32 %v1466_v44, %v1470_v0  ;;  %2805 = vmatprep.mubr.msk.bf16.mxu0 %vm2916_vm0, %v2915_v1 }
 0x2d0   : > { %v1472_v3 = vmul.f32 1.442695, %v1471_v2 }
 0x2d1   : > { %v1865_v4 = vpop.permute.xlu1 %1864 }
 0x2d2   : > { %2893 = vpow2.f32 %v1472_v3  ;;  %v1870_v9 = vsel %vm922_vm1, %v1865_v4, 0 }
 0x2d3   : > { %2804 = vmatpush3.bf16.xpose.msra.mxu0 %v1870_v9 }
 0x2d4   : > { %2815 = vmatprep.subr.bf16.mxu0 %v2915_v1 }
 0x2d5   : > { %v1863_v11 = vpop.permute.xlu1 %1862 }
 0x2d9   : > { %v1538_v15 = vpop.permute.xlu1 %1537 }
 0x2da   : > { %v1540_v16 = vadd.f32 %v1538_v15, %v3120_v30  ;;  %2806 = vmatmul.mubr.msk.bf16.vlgmr.msra.gmra.mxu0 %vm922_vm1, %v1863_v11 }
 0x2db   : > { %2816 = vmatpush3.bf16.xpose.msra.mxu0 %v2009_v14  ;;  %2817 = vmatprep.mubr.msk.bf16.mxu0 %vm2916_vm0, %v2915_v1 }
 0x2dc   : > { %v1541_v17 = vpack.c.bf16 %v1540_v16, %v1540_v16  ;;  %2827 = vmatprep.subr.bf16.mxu0 %v2915_v1 }
 0x2dd   : > { %v2004_v21 = vpop.permute.xlu1 %2003 }
 0x2de   : > { %2062 = vrot.lane.b32.xlu1 %v1541_v17, %s2920_s5 }
 0x2df   : > { %v2894_v19 = vpop.eup %2893 }
 0x2e0   : > { %v1474_v20 = vsel %vm1467_vm15, %v2894_v19, 0.0 }
 0x2e1   : > { %1475 = vadd.xlane.f32.xlu0 %v1474_v20  ;;  %v1610_v23 = vpop.permute.xlu1 %1609 }
 0x2e2   : > { %2818 = vmatmul.mubr.msk.bf16.vlgmr.msra.gmra.mxu0 %vm922_vm1, %v2004_v21  ;;  %v1615_v32 = vsel %vm922_vm1, %v1610_v23, 0 }
 0x2e3   : > { %2829 = vmatprep.mubr.msk.bf16.mxu0 %vm2916_vm0, %v2915_v1 }
 0x2e5   : > { %v1608_v29 = vpop.permute.xlu1 %1607 }
 0x2f7   : > { %1711 = vrot.lane.b32.xlu0 %v3111_v22, %s2920_s5 }
 0x2fb   : > { %2065 = vrot.lane.b32.xlu0 %v3167_v60, %s2920_s5  ;;  %v1710_v60 = vpop.permute.xlu1 %1709 }
 0x2ff   : > { %v1814_v40 = vpop.permute.xlu1 %1813 }
 0x300   : > { %v1819_v44 = vsel %vm922_vm1, %v1814_v40, 0 }
 0x303   : > { %v1812_v47 = vpop.permute.xlu1 %1811 }
 0x307   : > { %v1916_v51 = vpop.permute.xlu1 %1915 }
 0x308   : > { %v1921_v52 = vsel %vm922_vm1, %v1916_v51, 0 }
 0x30b   : > { %v1914_v56 = vpop.permute.xlu1 %1913 }
 0x350   : > { %v2063_v59 = vpop.permute.xlu1 %2062 }
 0x36a   : > { %v1476_v30 = vpop.xlane.xlu0 %1475 }
 0x36b   : > { %2895 = vrcp.f32 %v1476_v30 }
 0x36e   : > { %v1712_v36 = vpop.permute.xlu0 %1711 }
 0x36f   : > { %v1717_v38 = vsel %vm922_vm1, %v1712_v36, 0 }
 0x372   : > { %v2066_v31 = vpop.permute.xlu0 %2065 }
 0x373   : > { %v2071_v13 = vsel %vm922_vm1, %v2066_v31, 0 }
 0x378   : > { %v2896_v24 = vpop.eup %2895 }
 0x379   : > { %v3311_v26 = vpop.f32.mrf.mxu0  ;;  %v1478_v28 = vmul.f32 %v2896_v24, %v2894_v19 }
 0x37b   : > { %v2771_v33 = vpop.f32.mrf.mxu0  ;;  %v1479_v34 = vpack.c.bf16 %v1478_v28, %v1478_v28 }
 0x37d   : > { %2764 = vmatmul.mubr.msk.bf16.vlgmr.msra.gmra.mxu1 %vm1467_vm15, %v1479_v34  ;;  %v1601_v35 = vpop.f32.mrf.mxu0 }
 0x37e   : > { %2774 = vmatpush3.bf16.xpose.msra.mxu1 %v1615_v32  ;;  %2775 = vmatprep.mubr.msk.bf16.mxu1 %vm2916_vm0, %v2915_v1 }
 0x37f   : > { %v2772_v22 = vpop.f32.mrf.mxu0  ;;  %2785 = vmatprep.subr.bf16.mxu1 %v2915_v1 }
 0x385   : > { %2776 = vmatmul.mubr.msk.bf16.vlgmr.msra.gmra.mxu1 %vm922_vm1, %v1608_v29  ;;  %v1702_v39 = vpop.f32.mrf.mxu0 }
 0x386   : > { %2786 = vmatpush3.bf16.xpose.msra.mxu1 %v1717_v38  ;;  %2787 = vmatprep.mubr.msk.bf16.mxu1 %vm2916_vm0, %v2915_v1  ;;  %v1967_v11 = vrot.slane %v1702_v39, 6 }
 0x387   : > { %v2783_v42 = vpop.f32.mrf.mxu0  ;;  %2797 = vmatprep.subr.bf16.mxu1 %v2915_v1 }
 0x389   : > { %v1705_v43 = vpop.f32.mrf.mxu0 }
 0x38b   : > { %v2784_v46 = vpop.f32.mrf.mxu0 }
 0x38d   : > { %2788 = vmatmul.mubr.msk.bf16.vlgmr.msra.gmra.mxu1 %vm922_vm1, %v1710_v60  ;;  %v1804_v48 = vpop.f32.mrf.mxu0 }
 0x38e   : > { %2798 = vmatpush3.bf16.xpose.msra.mxu1 %v1819_v44  ;;  %2799 = vmatprep.mubr.msk.bf16.mxu1 %vm2916_vm0, %v2915_v1  ;;  %v1973_v16 = vrot.slane %v1804_v48, 4 }
 0x38f   : > { %v2795_v49 = vpop.f32.mrf.mxu0  ;;  %2809 = vmatprep.subr.bf16.mxu1 %v2915_v1 }
 0x391   : > { %v1807_v50 = vpop.f32.mrf.mxu0 }
 0x393   : > { %v2796_v54 = vpop.f32.mrf.mxu0 }
 0x395   : > { %2800 = vmatmul.mubr.msk.bf16.vlgmr.msra.gmra.mxu1 %vm922_vm1, %v1812_v47 }
 0x396   : > { %2810 = vmatpush3.bf16.xpose.msra.mxu1 %v1921_v52  ;;  %2811 = vmatprep.mubr.msk.bf16.mxu1 %vm2916_vm0, %v2915_v1 }
 0x397   : > { %2821 = vmatprep.subr.bf16.mxu1 %v2915_v1 }
 0x39a   : > { %v1906_v55 = vpop.f32.mrf.mxu0 }
 0x39b   : > { %v1979_v28 = vrot.slane %v1906_v55, 2 }
 0x39c   : > { %v2807_v57 = vpop.f32.mrf.mxu0 }
 0x39d   : > { %2812 = vmatmul.mubr.msk.bf16.vlgmr.msra.gmra.mxu1 %vm922_vm1, %v1914_v56 }
 0x39e   : > { %2822 = vmatpush3.bf16.xpose.msra.mxu1 %v2071_v13  ;;  %v1909_v45 = vpop.f32.mrf.mxu0  ;;  %2823 = vmatprep.mubr.msk.bf16.mxu1 %vm2916_vm0, %v2915_v1 }
 0x39f   : > { %2833 = vmatprep.subr.bf16.mxu1 %v2915_v1 }
 0x3a0   : > { %v2808_v53 = vpop.f32.mrf.mxu0 }
 0x3a2   : > { %v2045_v58 = vpop.f32.mrf.mxu0 }
 0x3a3   : > { %2057 = vperm.xlu1 %2877, %v2045_v58   ;;  %2053 = vperm.xlu0 %2876, %v2045_v58   ;;  %v2886_v58 = vld [vmem:[%s3441_s8] sm:$0xff]  }
 0x3a4   : > { %v2819_v18 = vpop.f32.mrf.mxu0 }
 0x3a5   : > { %2824 = vmatmul.mubr.msk.bf16.vlgmr.msra.gmra.mxu1 %vm922_vm1, %v2063_v59 }
 0x3a6   : > { %v2048_v61 = vpop.f32.mrf.mxu0  ;;  %2837 = vmatprep.mubr.msk.bf16.mxu1 %vm2916_vm0, %v2915_v1 }
 0x3a7   : > { %2878 = vset.pattern.permute.xlu0 %v2917_v12 }
 0x3a8   : > { %v2820_v25 = vpop.f32.mrf.mxu0 }
 0x41e   : > { %v2058_v39 = vpop.permute.xlu1 %2057  ;;  %v2054_v40 = vpop.permute.xlu0 %2053 }
 0x41f   : > { %v2060_v46 = vsel %vm727_vm14, %v2054_v40, %v2058_v39 }
 0x43d   : > { %v3342_v62 = vpop.f32.mrf.mxu1 }
 0x43f   : > { %v2765_v63 = vpop.f32.mrf.mxu1 }
 0x441   : > { %v1524_v27 = vpop.f32.mrf.mxu1 }
 0x443   : > { %v2766_v0 = vpop.f32.mrf.mxu1 }
 0x445   : > { %v1651_v2 = vpop.f32.mrf.mxu1 }
 0x446   : > { %v1964_v4 = vrot.slane %v1651_v2, 7 }
 0x447   : > { %v2777_v3 = vpop.f32.mrf.mxu1 }
 0x448   : > { %v1984_v10 = vsel %vm1342_vm4, %v3311_v26, %v1964_v4 }
 0x449   : > { %v1654_v6 = vpop.f32.mrf.mxu1  ;;  %v1985_v12 = vsel %vm1344_vm5, %v1984_v10, %v1967_v11 }
 0x44b   : > { %v2778_v9 = vpop.f32.mrf.mxu1 }
 0x44d   : > { %v1753_v14 = vpop.f32.mrf.mxu1 }
 0x44e   : > { %v1970_v15 = vrot.slane %v1753_v14, 5 }
 0x44f   : > { %v2789_v17 = vpop.f32.mrf.mxu1 }
 0x450   : > { %v1986_v19 = vsel %vm1346_vm6, %v1985_v12, %v1970_v15  ;;  %v2887_v12 = vld [vmem:[%s3448_s15 + $0x8] sm:$0xff]  }
 0x451   : > { %v1756_v20 = vpop.f32.mrf.mxu1  ;;  %v1987_v21 = vsel %vm1348_vm3, %v1986_v19, %v1973_v16 }
 0x453   : > { %v2790_v30 = vpop.f32.mrf.mxu1 }
 0x454   : > { %v2597_v30 = vld [vmem:[%s3446_s13] ss:$0 sm:$0xff] }
 0x455   : > { %v1855_v23 = vpop.f32.mrf.mxu1 }
 0x456   : > { %v1976_v24 = vrot.slane %v1855_v23, 3 }
 0x457   : > { %v2801_v29 = vpop.f32.mrf.mxu1 }
 0x458   : > { %v1988_v32 = vsel %vm1350_vm7, %v1987_v21, %v1976_v24  ;;  %v2598_v24 = vld [vmem:[%s3447_s14] ss:$0 sm:$0xff] }
 0x459   : > { %v1858_v26 = vpop.f32.mrf.mxu1  ;;  %v1989_v33 = vsel %vm1352_vm8, %v1988_v32, %v1979_v28 }
 0x45a   : > { %v2889_v26 = vld [vmem:[%s3450_s17 + $0x18] sm:$0xff]  }
 0x45b   : > { %v2802_v34 = vpop.f32.mrf.mxu1 }
 0x45c   : > { %v2891_v34 = vld [vmem:[%s3450_s17 + $0x8] sm:$0xff]  }
 0x45d   : > { %v1957_v35 = vpop.f32.mrf.mxu1 }
 0x45e   : > { %v1982_v60 = vrot.slane %v1957_v35, 1  ;;  %v2892_v35 = vld [vmem:[%s3450_s17] sm:$0xff]  }
 0x45f   : > { %v2813_v22 = vpop.f32.mrf.mxu1 }
 0x460   : > { %v1990_v42 = vsel %vm1354_vm9, %v1989_v33, %v1982_v60  ;;  %v2890_v33 = vld [vmem:[%s3450_s17 + $0x10] sm:$0xff]   ;;  %v2599_v22 = vld [vmem:[%s3449_s16] ss:$0 sm:$0xff] }
 0x461   : > { %v1960_v36 = vpop.f32.mrf.mxu1 }
 0x463   : > { %v2814_v38 = vpop.f32.mrf.mxu1 }
 0x465   : > { %v2107_v43 = vpop.f32.mrf.mxu1 }
 0x466   : > { %v2108_v44 = vadd.f32 %v2107_v43, %v1990_v42 }
 0x467   : > { %v2825_v47 = vpop.f32.mrf.mxu1 }
 0x468   : > { %v2113_v48 = vadd.f32 %v2108_v44, %v2060_v46 }
 0x469   : > { %v2110_v49 = vpop.f32.mrf.mxu1 }
 0x46a   : > { %v2114_v50 = vadd.f32 %v2113_v48, %v3242_v41 }
 0x46b   : > { %v2826_v51 = vpop.f32.mrf.mxu1 }
 0x46c   : > { %v2115_v52 = vsel %vm1467_vm15, %v2114_v50, -inf }
 0x46d   : > { %2116 = vmax.xlane.f32.xlu0 %v2115_v52 }
 0x483   : > { %2128 = vrot.lane.b32.xlu0 %v3184_v5, %s2920_s5  ;;  %v2885_v5 = vld [vmem:[%s3441_s8 + $0x8] sm:$0xff]  }
 0x484   : > { %2834 = vmatpush3.bf16.msra.mxu1 %v2885_v5 }
 0x485   : > { %2835 = vmatprep.subr.bf16.mxu1 %v2915_v1 }
 0x488   : > { %2836 = vmatpush3.bf16.msra.mxu1 %v2886_v58 }
 0x489   : > { %2849 = vmatprep.subr.bf16.mxu1 %v2915_v1 }
 0x4f6   : > { %v2117_v54 = vpop.xlane.xlu0 %2116 }
 0x4f7   : > { %v2118_v31 = vsub.f32 %v2114_v50, %v2117_v54  ;;  %v2608_v54 = vld [vmem:[%s3451_s18] ss:$0 sm:$0xff] }
 0x4f9   : > { %v2119_v55 = vmul.f32 1.442695, %v2118_v31 }
 0x4fa   : > { %v2129_v56 = vpop.permute.xlu0 %2128 }
 0x4fb   : > { %2897 = vpow2.f32 %v2119_v55  ;;  %v2134_v37 = vsel %vm1348_vm3, %v2129_v56, 0 }
 0x4fc   : > { %2828 = vmatpush3.bf16.msra.mxu0 %v2134_v37 }
 0x4fd   : > { %2841 = vmatprep.subr.bf16.mxu0 %v2915_v1 }
 0x508   : > { %v2898_v7 = vpop.eup %2897 }
 0x509   : > { %v2121_v41 = vsel %vm1467_vm15, %v2898_v7, 0.0 }
 0x50a   : > { %2122 = vadd.xlane.f32.xlu1 %v2121_v41 }
 0x593   : > { %v2123_v57 = vpop.xlane.xlu1 %2122 }
 0x594   : > { %2899 = vrcp.f32 %v2123_v57 }
 0x5a1   : > { %v2900_v13 = vpop.eup %2899 }
 0x5a2   : > { %v2125_v45 = vmul.f32 %v2900_v13, %v2898_v7 }
 0x5a4   : > { %v2126_v53 = vpack.c.bf16 %v2125_v45, %v2125_v45 }
 0x5a6   : > { %2830 = vmatmul.mubr.msk.bf16.vlgmr.msra.gmra.mxu0 %vm1467_vm15, %v2126_v53 }
 0x5a7   : > { %2845 = vmatprep.mubr.msk.bf16.mxu0 %vm2916_vm0, %v2915_v1  ;;  %2842 = vmatpush3.bf16.msra.mxu0 %v2887_v12 }
 0x5a8   : > { %2843 = vmatprep.subr.bf16.mxu0 %v2915_v1 }
 0x666   : > { %v2170_v59 = vpop.f32.mrf.mxu0 }
 0x667   : > { %2177 = vrot.lane.b32.xlu1 %v2170_v59, %s2919_s0 }
 0x668   : > { %v2831_v18 = vpop.f32.mrf.mxu0 }
 0x66a   : > { %v2173_v61 = vpop.f32.mrf.mxu0 }
 0x66c   : > { %v2832_v25 = vpop.f32.mrf.mxu0 }
 0x66d   : > { %v2609_v25 = vld [vmem:[%s3452_s19] ss:$0 sm:$0xff] }
 0x6d9   : > { %v2178_v63 = vpop.permute.xlu1 %2177 }
 0x6da   : > { %v2180_v27 = vsel %vm922_vm1, %v3342_v62, %v2178_v63 }
 0x6db   : > { %v2185_v0 = vpack.c.bf16 %v2180_v27, %v2180_v27  ;;  %v2610_v27 = vld [vmem:[%s3453_s20] ss:$0 sm:$0xff] }
 0x6dd   : > { %2838 = vmatmul.mubr.msk.bf16.vlgmr.msra.gmra.mxu1 %vm745_vm2, %v2185_v0 }
 0x6de   : > { %2857 = vmatprep.mubr.msk.bf16.mxu1 %vm2916_vm0, %v2915_v1  ;;  %2850 = vmatpush3.bf16.msra.mxu1 %v2889_v26  ;;  %vm2381_vm0 = vcmask 523264  }
 0x6df   : > { %2851 = vmatprep.subr.bf16.mxu1 %v2915_v1 }
 0x6e2   : > { %2852 = vmatpush3.bf16.msra.mxu1 %v2890_v33 }
 0x6e3   : > { %2853 = vmatprep.subr.bf16.mxu1 %v2915_v1 }
 0x6e6   : > { %2854 = vmatpush3.bf16.msra.mxu1 %v2891_v34 }
 0x6e7   : > { %2855 = vmatprep.subr.bf16.mxu1 %v2915_v1 }
 0x6ea   : > { %2856 = vmatpush3.bf16.msra.mxu1 %v2892_v35 }
 0x79d   : > { %v2235_v2 = vpop.f32.mrf.mxu1 }
 0x79e   : > { %v2241_v3 = vadd.f32 %v2235_v2, %v3077_v8  ;;  %v2888_v8 = vld [vmem:[%s3448_s15] sm:$0xff]  }
 0x79f   : > { %v2839_v4 = vpop.f32.mrf.mxu1  ;;  %2844 = vmatpush3.bf16.msra.mxu0 %v2888_v8 }
 0x7a0   : > { %v2244_v6 = vsel %vm745_vm2, %v2241_v3, 0.0 }
 0x7a1   : > { %2245 = vadd.xlane.f32.xlu0 %v2244_v6  ;;  %v2238_v9 = vpop.f32.mrf.mxu1 }
 0x7a3   : > { %v2840_v10 = vpop.f32.mrf.mxu1 }
 0x82a   : > { %v2246_v11 = vpop.xlane.xlu0 %2245 }
 0x82b   : > { %v2248_v14 = vmul.f32 0.03125, %v2246_v11 }
 0x82d   : > { %v2249_v15 = vsub.f32 %v2241_v3, %v2248_v14 }
 0x82f   : > { %v2250_v16 = vmul.f32 %v2249_v15, %v2249_v15 }
 0x831   : > { %v2251_v62 = vsel %vm745_vm2, %v2250_v16, 0.0 }
 0x832   : > { %2252 = vadd.xlane.f32.xlu1 %v2251_v62 }
 0x8bb   : > { %v2253_v17 = vpop.xlane.xlu1 %2252 }
 0x8bc   : > { %v2254_v19 = vmul.f32 0.03125, %v2253_v17 }
 0x8be   : > { %v2255_v20 = vadd.f32 1e-12, %v2254_v19 }
 0x8c0   : > { %2901 = vrsqrt.f32 %v2255_v20 }
 0x8cd   : > { %v2902_v21 = vpop.eup %2901 }
 0x8ce   : > { %v2257_v23 = vmul.f32 %v2902_v21, %v2249_v15 }
 0x8d0   : > { %v2264_v28 = vmul.f32 %v2597_v30, %v2257_v23 }
 0x8d2   : > { %v2271_v29 = vadd.f32 %v2598_v24, %v2264_v28 }
 0x8d4   : > { %v2276_v32 = vpack.c.bf16 %v2271_v29, %v2271_v29 }
 0x8d6   : > { %2846 = vmatmul.mubr.msk.bf16.vlgmr.msra.gmra.mxu0 %vm745_vm2, %v2276_v32 }
 0x996   : > { %v2333_v60 = vpop.f32.mrf.mxu0 }
 0x997   : > { %v2334_v36 = vadd.f32 %v2599_v22, %v2333_v60 }
 0x998   : > { %v2847_v38 = vpop.f32.mrf.mxu0 }
 0x999   : > { %v2340_v39 = vmul.f32 0.044715, %v2334_v36  ;;  %v2339_v49 = vmul.f32 0.5, %v2334_v36 }
 0x99a   : > { %v2336_v40 = vpop.f32.mrf.mxu0 }
 0x99b   : > { %v2341_v42 = vmul.f32 %v2340_v39, %v2334_v36 }
 0x99c   : > { %v2848_v43 = vpop.f32.mrf.mxu0 }
 0x99d   : > { %v2342_v44 = vmul.f32 %v2341_v42, %v2334_v36 }
 0x99f   : > { %v2343_v46 = vadd.f32 %v2342_v44, %v2334_v36 }
 0x9a1   : > { %v2344_v47 = vmul.f32 0.7978846, %v2343_v46 }
 0x9a3   : > { %2903 = vtanh.f32 %v2344_v47 }
 0x9b0   : > { %v2904_v48 = vpop.eup %2903 }
 0x9b1   : > { %v2346_v50 = vadd.f32 1.0, %v2904_v48 }
 0x9b3   : > { %v2347_v1 = vmul.f32 %v2346_v50, %v2339_v49 }
 0x9b5   : > { %v2356_v51 = vpack.c.bf16 %v2347_v1, %v2347_v1 }
 0x9b7   : > { %2858 = vmatmul.mubr.msk.bf16.vlgmr.msra.gmra.mxu1 %vm2381_vm0, %v2356_v51 }
 0xa77   : > { %v2419_v52 = vpop.f32.mrf.mxu1 }
 0xa78   : > { %v2425_v31 = vadd.f32 %v2419_v52, %v2271_v29 }
 0xa79   : > { %v2859_v55 = vpop.f32.mrf.mxu1 }
 0xa7a   : > { %v2433_v56 = vadd.f32 %v2608_v54, %v2425_v31 }
 0xa7b   : > { %v2422_v37 = vpop.f32.mrf.mxu1 }
 0xa7c   : > { %v2436_v7 = vsel %vm745_vm2, %v2433_v56, 0.0 }
 0xa7d   : > { %2437 = vadd.xlane.f32.xlu0 %v2436_v7  ;;  %v2860_v41 = vpop.f32.mrf.mxu1 }
 0xb06   : > { %v2438_v57 = vpop.xlane.xlu0 %2437 }
 0xb07   : > { %v2439_v13 = vmul.f32 0.03125, %v2438_v57 }
 0xb09   : > { %v2440_v45 = vsub.f32 %v2433_v56, %v2439_v13 }
 0xb0b   : > { %v2441_v53 = vmul.f32 %v2440_v45, %v2440_v45 }
 0xb0d   : > { %v2442_v5 = vsel %vm745_vm2, %v2441_v53, 0.0 }
 0xb0e   : > { %2443 = vadd.xlane.f32.xlu0 %v2442_v5 }
 0xb97   : > { %v2444_v58 = vpop.xlane.xlu0 %2443 }
 0xb98   : > { %v2445_v59 = vmul.f32 0.03125, %v2444_v58 }
 0xb9a   : > { %v2446_v18 = vadd.f32 1e-12, %v2445_v59 }
 0xb9c   : > { %2905 = vrsqrt.f32 %v2446_v18 }
 0xba9   : > { %v2906_v61 = vpop.eup %2905 }
 0xbaa   : > { %v2448_v63 = vmul.f32 %v2906_v61, %v2440_v45 }
 0xbac   : > { %v2455_v0 = vmul.f32 %v2609_v25, %v2448_v63 }
 0xbae   : > { %v2462_v2 = vadd.f32 %v2610_v27, %v2455_v0 }
 0xbb0   : > { %2463 = vst.msk [vmem:[%s696_s23] sm:$0xff] %vm745_vm2, %v2462_v2 }
 0xbb1 PF: > { %s31_s2 = sadd.s32 1, %s2913_s2  }
 0xbb2   : > { %p28_p4 = scmp.ge.s32.totalorder %s31_s2, 4  }
 0xbb4   :  { %30 = sbr.rel (!%p28_p4) target bundleno = 7 (0x7), region = 144 }

</bundles_post_ra>
